<compile_context>
chip_gen: v5e
topology: v5e:2x2
jax: 0.10.0
libtpu: 0.0.40
codegen_flags: <defaults>
</compile_context>

<pallas_src>
import functools

import jax
import jax.numpy as jnp
from jax import lax
from jax.experimental import pallas as pl
from jax.experimental.pallas import tpu as pltpu


# --------------------------------------------------------------------------
# phase 1: chained nodevec update  nv <- tanh(alpha * Linear_i(nv * scale_i))
# Single invocation (no grid); the f_num-layer chain is an unrolled loop.
# --------------------------------------------------------------------------
def _nodevec_kernel(scale_ref, nv1_ref, nv2_ref, w1t_ref, b1_ref, w2t_ref,
                    b2_ref, nv1_out_ref, nv2_out_ref, *, alpha, f_num,
                    mxu_dtype):
    nv1 = nv1_ref[...]                       # f32 state carried across layers
    nv2 = nv2_ref[...]
    for i in range(f_num):                   # unrolled, f_num is small
        s = scale_ref[i]                     # scalar from SMEM
        x1 = (nv1 * s).astype(mxu_dtype)     # bf16 MXU inputs on v6e/v7x
        x2 = (nv2 * s).astype(mxu_dtype)
        nv1 = jnp.tanh(alpha * (jnp.dot(x1, w1t_ref[i],
                                        preferred_element_type=jnp.float32)
                                + b1_ref[i]))
        nv2 = jnp.tanh(alpha * (jnp.dot(x2, w2t_ref[i],
                                        preferred_element_type=jnp.float32)
                                + b2_ref[i]))
        nv1_out_ref[i] = nv1.astype(nv1_out_ref.dtype)   # bf16 inter-phase HBM
        nv2_out_ref[i] = nv2.astype(nv2_out_ref.dtype)


# --------------------------------------------------------------------------
# phase 2: adjacency + top-k row masking, fully parallel over (layer, rowtile)
# --------------------------------------------------------------------------
def _adj_topk_kernel(nv1_rows_ref, nv2_rows_ref, nv1_all_ref, nv2_all_ref,
                     adj_ref, *, alpha, k, n_valid, n_col):
    p_rows = nv1_rows_ref[0]                 # (row_tile, dim), mxu dtype
    q_rows = nv2_rows_ref[0]
    p_all = nv1_all_ref[0]                   # (n_col, dim)
    q_all = nv2_all_ref[0]

    dims = (((1,), (1,)), ((), ()))
    m12 = lax.dot_general(p_rows, q_all, dims,
                          preferred_element_type=jnp.float32)
    m21 = lax.dot_general(q_rows, p_all, dims,
                          preferred_element_type=jnp.float32)
    a = m12 - m21                            # (row_tile, n_col) f32

    # Single EUP tanh pass; the selection keys == the output values, so
    # tie-breaking (lowest column index) matches lax.top_k / torch.topk on
    # relu(tanh(alpha*a)) exactly, including saturated-to-1.0 ties.
    adj0 = jnp.maximum(jnp.tanh(alpha * a), 0.0)

    col = lax.broadcasted_iota(jnp.int32, adj0.shape, 1)
    neg_inf = jnp.float32(-jnp.inf)
    if n_valid == n_col:                     # compile-time specialization
        work0 = adj0
    else:
        work0 = jnp.where(col < n_valid, adj0, neg_inf)   # exclude padded cols

    def body(_, work):
        row_max = jnp.max(work, axis=1, keepdims=True)
        hit = work == row_max
        min_idx = jnp.min(jnp.where(hit, col, n_col), axis=1, keepdims=True)
        return jnp.where(col == min_idx, neg_inf, work)

    work = lax.fori_loop(0, k, body, work0, unroll=True)

    selected = work == neg_inf               # exhausted == selected (adj0>=0)
    if n_valid != n_col:
        selected = jnp.logical_and(selected, col < n_valid)
    adj_ref[0] = jnp.where(selected, adj0, jnp.float32(0.0)).astype(adj_ref.dtype)


# --------------------------------------------------------------------------
# wrapper
# --------------------------------------------------------------------------
def _round_up(x, m):
    return (x + m - 1) // m * m


def _vmem_budget():
    try:
        cap = int(getattr(pltpu.get_tpu_info(), "vmem_capacity_bytes",
                          64 * 1024 * 1024))
    except Exception:
        cap = 64 * 1024 * 1024               # conservative (v7x per-TC VMEM)
    limit = max(min(cap - (8 << 20), 112 << 20), 32 << 20)
    return limit


def _pick_row_tile(n_row, n_col, dim, out_bytes, nv_bytes, f_num, budget):
    cands = sorted({t for t in (n_row, 4096, 2048, 1024, 512, 256, 128, 64,
                                32, 16, 8)
                    if 0 < t <= n_row and n_row % t == 0}, reverse=True)
    row_tile = 8
    for t in cands:
        need = (2 * t * n_col * out_bytes            # double-buffered out tile
                + 6 * t * n_col * 4                  # a/adj0/work/col/hit/...
                + 2 * 2 * (t + n_col) * dim * nv_bytes)   # db'd nodevec blocks
        if need <= budget:
            row_tile = t
            break
    # v7x megacore: guarantee >=2 parallel grid steps when splittable.
    if f_num * (n_row // row_tile) < 2 and row_tile % 16 == 0:
        row_tile //= 2
    return row_tile


def graph_constructor_forward(idx, scale_set, emb1_w, emb2_w, w1, b1, w2, b2,
                              *, alpha, k, mxu_dtype=jnp.bfloat16,
                              out_dtype=jnp.float32, row_tile=None):
    """Returns a list of f_num adjacency matrices of shape (N, N)."""
    n = int(idx.shape[0])
    dim = int(emb1_w.shape[1])
    f_num = int(w1.shape[0])
    assert k <= n, "k must not exceed the number of nodes (torch.topk errors)"

    # Columns (lane axis) padded to 128 for unmasked stores; rows (sublane
    # axis) only to 8.  Nodevecs need n_col rows (they feed the column side).
    n_col = _round_up(max(n, 8), 128)
    n_row = _round_up(n, 8)

    out_bytes = jnp.dtype(out_dtype).itemsize
    nv_bytes = jnp.dtype(mxu_dtype).itemsize
    vmem_limit = _vmem_budget()
    if row_tile is None:
        row_tile = _pick_row_tile(n_row, n_col, dim, out_bytes, nv_bytes,
                                  f_num, int(vmem_limit * 0.8))
    assert n_row % row_tile == 0 and row_tile % 8 == 0

    # Glue outside the kernels: embedding gather, padding, weight pre-cast.
    nv1_0 = jnp.take(emb1_w, idx, axis=0).astype(jnp.float32)
    nv2_0 = jnp.take(emb2_w, idx, axis=0).astype(jnp.float32)
    nv1_0 = jnp.pad(nv1_0, ((0, n_col - n), (0, 0)))
    nv2_0 = jnp.pad(nv2_0, ((0, n_col - n), (0, 0)))
    w1t = jnp.transpose(w1, (0, 2, 1)).astype(mxu_dtype)    # (f_num, in, out)
    w2t = jnp.transpose(w2, (0, 2, 1)).astype(mxu_dtype)
    b1r = b1.reshape(f_num, 1, dim).astype(jnp.float32)
    b2r = b2.reshape(f_num, 1, dim).astype(jnp.float32)
    scale = scale_set.astype(jnp.float32).reshape(f_num)

    # ---- phase 1: single-step chained nodevec update -----------------------
    vmem_spec = pl.BlockSpec(memory_space=pltpu.MemorySpace.VMEM)
    smem_spec = pl.BlockSpec(memory_space=pltpu.MemorySpace.SMEM)
    nv_shape = jax.ShapeDtypeStruct((f_num, n_col, dim), mxu_dtype)
    nv1_all, nv2_all = pl.pallas_call(
        functools.partial(_nodevec_kernel, alpha=float(alpha), f_num=f_num,
                          mxu_dtype=mxu_dtype),
        out_shape=(nv_shape, nv_shape),
        in_specs=[smem_spec, vmem_spec, vmem_spec, vmem_spec, vmem_spec,
                  vmem_spec, vmem_spec],
        out_specs=(vmem_spec, vmem_spec),
    )(scale, nv1_0, nv2_0, w1t, b1r, w2t, b2r)

    # ---- phase 2: adjacency + top-k, independent per (layer, row tile) -----
    adj = pl.pallas_call(
        functools.partial(_adj_topk_kernel, alpha=float(alpha), k=int(k),
                          n_valid=n, n_col=n_col),
        out_shape=jax.ShapeDtypeStruct((f_num, n_row, n_col), out_dtype),
        grid=(f_num, n_row // row_tile),
        in_specs=[
            pl.BlockSpec((1, row_tile, dim), lambda i, r: (i, r, 0)),  # nv1 rows
            pl.BlockSpec((1, row_tile, dim), lambda i, r: (i, r, 0)),  # nv2 rows
            pl.BlockSpec((1, n_col, dim), lambda i, r: (i, 0, 0)),     # nv1 all
            pl.BlockSpec((1, n_col, dim), lambda i, r: (i, 0, 0)),     # nv2 all
        ],
        out_specs=pl.BlockSpec((1, row_tile, n_col), lambda i, r: (i, r, 0)),
        compiler_params=pltpu.CompilerParams(
            dimension_semantics=("parallel", "parallel"),
            vmem_limit_bytes=int(vmem_limit)),
    )(nv1_all, nv2_all, nv1_all, nv2_all)

    adj = adj[:, :n, :n]
    return [adj[i] for i in range(f_num)]


# --------------------------------------------------------------------------
# pure-JAX reference (mirrors the PyTorch module; optional bf16 MXU inputs to
# mirror the kernel's mixed-precision fast path)
# --------------------------------------------------------------------------
def _reference(idx, scale_set, emb1_w, emb2_w, w1, b1, w2, b2, *, alpha, k,
               mxu_dtype=jnp.float32):
    nv1 = jnp.take(emb1_w, idx, axis=0).astype(jnp.float32)
    nv2 = jnp.take(emb2_w, idx, axis=0).astype(jnp.float32)
    adjs = []
    for i in range(w1.shape[0]):
        x1 = (nv1 * scale_set[i]).astype(mxu_dtype)
        x2 = (nv2 * scale_set[i]).astype(mxu_dtype)
        nv1 = jnp.tanh(alpha * (jnp.dot(x1, w1[i].T.astype(mxu_dtype),
                                        preferred_element_type=jnp.float32)
                                + b1[i]))
        nv2 = jnp.tanh(alpha * (jnp.dot(x2, w2[i].T.astype(mxu_dtype),
                                        preferred_element_type=jnp.float32)
                                + b2[i]))
        p = nv1.astype(mxu_dtype)
        q = nv2.astype(mxu_dtype)
        a = (jnp.dot(p, q.T, preferred_element_type=jnp.float32)
             - jnp.dot(q, p.T, preferred_element_type=jnp.float32))
        adj0 = jax.nn.relu(jnp.tanh(alpha * a))
        _, ind = lax.top_k(adj0, k)
        rows = jnp.arange(adj0.shape[0])[:, None]
        mask = jnp.zeros_like(adj0).at[rows, ind].set(1.0)
        adjs.append(adj0 * mask)
    return adjs


if __name__ == "__main__":
    # Small, module-consistent sizes.
    nnodes, dim, f_num, k, alpha = 8, 32, 3, 3, 3.0

    key = jax.random.PRNGKey(0)
    k1, k2, k3, k4, k5, k6 = jax.random.split(key, 6)

    emb1_w = jax.random.normal(k1, (nnodes, dim), jnp.float32)
    emb2_w = jax.random.normal(k2, (nnodes, dim), jnp.float32)
    w1 = jax.random.normal(k3, (f_num, dim, dim), jnp.float32) * 0.2   # (out, in)
    b1 = jax.random.normal(k4, (f_num, dim), jnp.float32) * 0.1
    w2 = jax.random.normal(k5, (f_num, dim, dim), jnp.float32) * 0.2
    b2 = jax.random.normal(k6, (f_num, dim), jnp.float32) * 0.1

    idx = jnp.arange(nnodes, dtype=jnp.int32)
    scale_set = jnp.array([1.0, 0.8, 1.2], dtype=jnp.float32)

    # 1) f32 MXU path: must match the (PyTorch-faithful) f32 reference tightly.
    adj_f32 = graph_constructor_forward(idx, scale_set, emb1_w, emb2_w,
                                        w1, b1, w2, b2, alpha=alpha, k=k,
                                        mxu_dtype=jnp.float32)
    adj_f32 = [jax.block_until_ready(a) for a in adj_f32]
    ref_f32 = _reference(idx, scale_set, emb1_w, emb2_w, w1, b1, w2, b2,
                         alpha=alpha, k=k, mxu_dtype=jnp.float32)
    for got, ref in zip(adj_f32, ref_f32):
        assert got.shape == (nnodes, nnodes)
        assert jnp.allclose(got, ref, atol=1e-4), "f32 path mismatch"

    # 2) bf16-MXU fast path (default; v6e/v7x): checked against a reference
    #    that applies the same input quantization.
    adj_bf16 = graph_constructor_forward(idx, scale_set, emb1_w, emb2_w,
                                         w1, b1, w2, b2, alpha=alpha, k=k,
                                         mxu_dtype=jnp.bfloat16)
    adj_bf16 = [jax.block_until_ready(a) for a in adj_bf16]
    ref_bf16 = _reference(idx, scale_set, emb1_w, emb2_w, w1, b1, w2, b2,
                          alpha=alpha, k=k, mxu_dtype=jnp.bfloat16)
    for got, ref in zip(adj_bf16, ref_bf16):
        assert got.shape == (nnodes, nnodes)
        assert jnp.allclose(got, ref, atol=2e-3), "bf16 path mismatch"

    print("KERNEL_OK")
</pallas_src>

<mosaic_0001>
module attributes {stable_mosaic.version = 11 : i64} {
  func.func @_nodevec_kernel(%arg0: memref<3xf32, #tpu.memory_space<smem>>, %arg1: memref<128x32xf32, #tpu.memory_space<vmem>>, %arg2: memref<128x32xf32, #tpu.memory_space<vmem>>, %arg3: memref<3x32x32xf32, #tpu.memory_space<vmem>>, %arg4: memref<3x1x32xf32, #tpu.memory_space<vmem>>, %arg5: memref<3x32x32xf32, #tpu.memory_space<vmem>>, %arg6: memref<3x1x32xf32, #tpu.memory_space<vmem>>, %arg7: memref<3x128x32xf32, #tpu.memory_space<vmem>>, %arg8: memref<3x128x32xf32, #tpu.memory_space<vmem>>) attributes {dimension_semantics = [], scalar_prefetch = 0 : i64, scratch_operands = 0 : i64, tpu.core_type = #tpu.core_type<tc>} {
    %c0 = arith.constant 0 : index
    %c0_0 = arith.constant 0 : index
    %0 = vector.load %arg1[%c0, %c0_0] : memref<128x32xf32, #tpu.memory_space<vmem>>, vector<128x32xf32>
    %c0_1 = arith.constant 0 : index
    %c0_2 = arith.constant 0 : index
    %1 = vector.load %arg2[%c0_1, %c0_2] : memref<128x32xf32, #tpu.memory_space<vmem>>, vector<128x32xf32>
    %c0_3 = arith.constant 0 : index
    %2 = memref.load %arg0[%c0_3] : memref<3xf32, #tpu.memory_space<smem>>
    %3 = vector.broadcast %2 : f32 to vector<128x32xf32>
    %4 = arith.mulf %0, %3 : vector<128x32xf32>
    %5 = vector.broadcast %2 : f32 to vector<128x32xf32>
    %6 = arith.mulf %1, %5 : vector<128x32xf32>
    %c0_4 = arith.constant 0 : index
    %c0_5 = arith.constant 0 : index
    %c0_6 = arith.constant 0 : index
    %7 = vector.load %arg3[%c0_4, %c0_5, %c0_6] : memref<3x32x32xf32, #tpu.memory_space<vmem>>, vector<1x32x32xf32>
    %8 = vector.shape_cast %7 : vector<1x32x32xf32> to vector<32x32xf32>
    %cst = arith.constant dense<0.000000e+00> : vector<128x32xf32>
    %9 = tpu.matmul %4, %8, %cst {dimension_numbers = #tpu.dot_dimension_numbers<[1], [0], [0], [1], [0, 0, 1, 1], [], []>} : vector<128x32xf32>, vector<32x32xf32>, vector<128x32xf32> -> vector<128x32xf32>
    %c0_7 = arith.constant 0 : index
    %c0_8 = arith.constant 0 : index
    %c0_9 = arith.constant 0 : index
    %10 = vector.load %arg4[%c0_7, %c0_8, %c0_9] : memref<3x1x32xf32, #tpu.memory_space<vmem>>, vector<1x1x32xf32>
    %11 = vector.shape_cast %10 : vector<1x1x32xf32> to vector<1x32xf32>
    %12 = vector.broadcast %11 : vector<1x32xf32> to vector<128x32xf32>
    %13 = arith.addf %9, %12 : vector<128x32xf32>
    %cst_10 = arith.constant 3.000000e+00 : f32
    %14 = vector.broadcast %cst_10 : f32 to vector<128x32xf32>
    %15 = arith.mulf %14, %13 : vector<128x32xf32>
    %16 = math.tanh %15 : vector<128x32xf32>
    %c0_11 = arith.constant 0 : index
    %c0_12 = arith.constant 0 : index
    %c0_13 = arith.constant 0 : index
    %17 = vector.load %arg5[%c0_11, %c0_12, %c0_13] : memref<3x32x32xf32, #tpu.memory_space<vmem>>, vector<1x32x32xf32>
    %18 = vector.shape_cast %17 : vector<1x32x32xf32> to vector<32x32xf32>
    %cst_14 = arith.constant dense<0.000000e+00> : vector<128x32xf32>
    %19 = tpu.matmul %6, %18, %cst_14 {dimension_numbers = #tpu.dot_dimension_numbers<[1], [0], [0], [1], [0, 0, 1, 1], [], []>} : vector<128x32xf32>, vector<32x32xf32>, vector<128x32xf32> -> vector<128x32xf32>
    %c0_15 = arith.constant 0 : index
    %c0_16 = arith.constant 0 : index
    %c0_17 = arith.constant 0 : index
    %20 = vector.load %arg6[%c0_15, %c0_16, %c0_17] : memref<3x1x32xf32, #tpu.memory_space<vmem>>, vector<1x1x32xf32>
    %21 = vector.shape_cast %20 : vector<1x1x32xf32> to vector<1x32xf32>
    %22 = vector.broadcast %21 : vector<1x32xf32> to vector<128x32xf32>
    %23 = arith.addf %19, %22 : vector<128x32xf32>
    %cst_18 = arith.constant 3.000000e+00 : f32
    %24 = vector.broadcast %cst_18 : f32 to vector<128x32xf32>
    %25 = arith.mulf %24, %23 : vector<128x32xf32>
    %26 = math.tanh %25 : vector<128x32xf32>
    %c0_19 = arith.constant 0 : index
    %c0_20 = arith.constant 0 : index
    %c0_21 = arith.constant 0 : index
    %27 = vector.load %arg7[%c0_19, %c0_20, %c0_21] : memref<3x128x32xf32, #tpu.memory_space<vmem>>, vector<1x128x32xf32>
    %28 = vector.shape_cast %27 : vector<1x128x32xf32> to vector<128x32xf32>
    %29 = vector.shape_cast %16 : vector<128x32xf32> to vector<1x128x32xf32>
    tpu.vector_store %arg7[%c0_19, %c0_20, %c0_21], %29 {strides = array<i32>} : memref<3x128x32xf32, #tpu.memory_space<vmem>>, vector<1x128x32xf32>,
    %c0_22 = arith.constant 0 : index
    %c0_23 = arith.constant 0 : index
    %c0_24 = arith.constant 0 : index
    %30 = vector.load %arg8[%c0_22, %c0_23, %c0_24] : memref<3x128x32xf32, #tpu.memory_space<vmem>>, vector<1x128x32xf32>
    %31 = vector.shape_cast %30 : vector<1x128x32xf32> to vector<128x32xf32>
    %32 = vector.shape_cast %26 : vector<128x32xf32> to vector<1x128x32xf32>
    tpu.vector_store %arg8[%c0_22, %c0_23, %c0_24], %32 {strides = array<i32>} : memref<3x128x32xf32, #tpu.memory_space<vmem>>, vector<1x128x32xf32>,
    %c1 = arith.constant 1 : index
    %33 = memref.load %arg0[%c1] : memref<3xf32, #tpu.memory_space<smem>>
    %34 = vector.broadcast %33 : f32 to vector<128x32xf32>
    %35 = arith.mulf %16, %34 : vector<128x32xf32>
    %36 = vector.broadcast %33 : f32 to vector<128x32xf32>
    %37 = arith.mulf %26, %36 : vector<128x32xf32>
    %c1_25 = arith.constant 1 : index
    %c0_26 = arith.constant 0 : index
    %c0_27 = arith.constant 0 : index
    %38 = vector.load %arg3[%c1_25, %c0_26, %c0_27] : memref<3x32x32xf32, #tpu.memory_space<vmem>>, vector<1x32x32xf32>
    %39 = vector.shape_cast %38 : vector<1x32x32xf32> to vector<32x32xf32>
    %cst_28 = arith.constant dense<0.000000e+00> : vector<128x32xf32>
    %40 = tpu.matmul %35, %39, %cst_28 {dimension_numbers = #tpu.dot_dimension_numbers<[1], [0], [0], [1], [0, 0, 1, 1], [], []>} : vector<128x32xf32>, vector<32x32xf32>, vector<128x32xf32> -> vector<128x32xf32>
    %c1_29 = arith.constant 1 : index
    %c0_30 = arith.constant 0 : index
    %c0_31 = arith.constant 0 : index
    %41 = vector.load %arg4[%c1_29, %c0_30, %c0_31] : memref<3x1x32xf32, #tpu.memory_space<vmem>>, vector<1x1x32xf32>
    %42 = vector.shape_cast %41 : vector<1x1x32xf32> to vector<1x32xf32>
    %43 = vector.broadcast %42 : vector<1x32xf32> to vector<128x32xf32>
    %44 = arith.addf %40, %43 : vector<128x32xf32>
    %cst_32 = arith.constant 3.000000e+00 : f32
    %45 = vector.broadcast %cst_32 : f32 to vector<128x32xf32>
    %46 = arith.mulf %45, %44 : vector<128x32xf32>
    %47 = math.tanh %46 : vector<128x32xf32>
    %c1_33 = arith.constant 1 : index
    %c0_34 = arith.constant 0 : index
    %c0_35 = arith.constant 0 : index
    %48 = vector.load %arg5[%c1_33, %c0_34, %c0_35] : memref<3x32x32xf32, #tpu.memory_space<vmem>>, vector<1x32x32xf32>
    %49 = vector.shape_cast %48 : vector<1x32x32xf32> to vector<32x32xf32>
    %cst_36 = arith.constant dense<0.000000e+00> : vector<128x32xf32>
    %50 = tpu.matmul %37, %49, %cst_36 {dimension_numbers = #tpu.dot_dimension_numbers<[1], [0], [0], [1], [0, 0, 1, 1], [], []>} : vector<128x32xf32>, vector<32x32xf32>, vector<128x32xf32> -> vector<128x32xf32>
    %c1_37 = arith.constant 1 : index
    %c0_38 = arith.constant 0 : index
    %c0_39 = arith.constant 0 : index
    %51 = vector.load %arg6[%c1_37, %c0_38, %c0_39] : memref<3x1x32xf32, #tpu.memory_space<vmem>>, vector<1x1x32xf32>
    %52 = vector.shape_cast %51 : vector<1x1x32xf32> to vector<1x32xf32>
    %53 = vector.broadcast %52 : vector<1x32xf32> to vector<128x32xf32>
    %54 = arith.addf %50, %53 : vector<128x32xf32>
    %cst_40 = arith.constant 3.000000e+00 : f32
    %55 = vector.broadcast %cst_40 : f32 to vector<128x32xf32>
    %56 = arith.mulf %55, %54 : vector<128x32xf32>
    %57 = math.tanh %56 : vector<128x32xf32>
    %c1_41 = arith.constant 1 : index
    %c0_42 = arith.constant 0 : index
    %c0_43 = arith.constant 0 : index
    %58 = vector.load %arg7[%c1_41, %c0_42, %c0_43] : memref<3x128x32xf32, #tpu.memory_space<vmem>>, vector<1x128x32xf32>
    %59 = vector.shape_cast %58 : vector<1x128x32xf32> to vector<128x32xf32>
    %60 = vector.shape_cast %47 : vector<128x32xf32> to vector<1x128x32xf32>
    tpu.vector_store %arg7[%c1_41, %c0_42, %c0_43], %60 {strides = array<i32>} : memref<3x128x32xf32, #tpu.memory_space<vmem>>, vector<1x128x32xf32>,
    %c1_44 = arith.constant 1 : index
    %c0_45 = arith.constant 0 : index
    %c0_46 = arith.constant 0 : index
    %61 = vector.load %arg8[%c1_44, %c0_45, %c0_46] : memref<3x128x32xf32, #tpu.memory_space<vmem>>, vector<1x128x32xf32>
    %62 = vector.shape_cast %61 : vector<1x128x32xf32> to vector<128x32xf32>
    %63 = vector.shape_cast %57 : vector<128x32xf32> to vector<1x128x32xf32>
    tpu.vector_store %arg8[%c1_44, %c0_45, %c0_46], %63 {strides = array<i32>} : memref<3x128x32xf32, #tpu.memory_space<vmem>>, vector<1x128x32xf32>,
    %c2 = arith.constant 2 : index
    %64 = memref.load %arg0[%c2] : memref<3xf32, #tpu.memory_space<smem>>
    %65 = vector.broadcast %64 : f32 to vector<128x32xf32>
    %66 = arith.mulf %47, %65 : vector<128x32xf32>
    %67 = vector.broadcast %64 : f32 to vector<128x32xf32>
    %68 = arith.mulf %57, %67 : vector<128x32xf32>
    %c2_47 = arith.constant 2 : index
    %c0_48 = arith.constant 0 : index
    %c0_49 = arith.constant 0 : index
    %69 = vector.load %arg3[%c2_47, %c0_48, %c0_49] : memref<3x32x32xf32, #tpu.memory_space<vmem>>, vector<1x32x32xf32>
    %70 = vector.shape_cast %69 : vector<1x32x32xf32> to vector<32x32xf32>
    %cst_50 = arith.constant dense<0.000000e+00> : vector<128x32xf32>
    %71 = tpu.matmul %66, %70, %cst_50 {dimension_numbers = #tpu.dot_dimension_numbers<[1], [0], [0], [1], [0, 0, 1, 1], [], []>} : vector<128x32xf32>, vector<32x32xf32>, vector<128x32xf32> -> vector<128x32xf32>
    %c2_51 = arith.constant 2 : index
    %c0_52 = arith.constant 0 : index
    %c0_53 = arith.constant 0 : index
    %72 = vector.load %arg4[%c2_51, %c0_52, %c0_53] : memref<3x1x32xf32, #tpu.memory_space<vmem>>, vector<1x1x32xf32>
    %73 = vector.shape_cast %72 : vector<1x1x32xf32> to vector<1x32xf32>
    %74 = vector.broadcast %73 : vector<1x32xf32> to vector<128x32xf32>
    %75 = arith.addf %71, %74 : vector<128x32xf32>
    %cst_54 = arith.constant 3.000000e+00 : f32
    %76 = vector.broadcast %cst_54 : f32 to vector<128x32xf32>
    %77 = arith.mulf %76, %75 : vector<128x32xf32>
    %78 = math.tanh %77 : vector<128x32xf32>
    %c2_55 = arith.constant 2 : index
    %c0_56 = arith.constant 0 : index
    %c0_57 = arith.constant 0 : index
    %79 = vector.load %arg5[%c2_55, %c0_56, %c0_57] : memref<3x32x32xf32, #tpu.memory_space<vmem>>, vector<1x32x32xf32>
    %80 = vector.shape_cast %79 : vector<1x32x32xf32> to vector<32x32xf32>
    %cst_58 = arith.constant dense<0.000000e+00> : vector<128x32xf32>
    %81 = tpu.matmul %68, %80, %cst_58 {dimension_numbers = #tpu.dot_dimension_numbers<[1], [0], [0], [1], [0, 0, 1, 1], [], []>} : vector<128x32xf32>, vector<32x32xf32>, vector<128x32xf32> -> vector<128x32xf32>
    %c2_59 = arith.constant 2 : index
    %c0_60 = arith.constant 0 : index
    %c0_61 = arith.constant 0 : index
    %82 = vector.load %arg6[%c2_59, %c0_60, %c0_61] : memref<3x1x32xf32, #tpu.memory_space<vmem>>, vector<1x1x32xf32>
    %83 = vector.shape_cast %82 : vector<1x1x32xf32> to vector<1x32xf32>
    %84 = vector.broadcast %83 : vector<1x32xf32> to vector<128x32xf32>
    %85 = arith.addf %81, %84 : vector<128x32xf32>
    %cst_62 = arith.constant 3.000000e+00 : f32
    %86 = vector.broadcast %cst_62 : f32 to vector<128x32xf32>
    %87 = arith.mulf %86, %85 : vector<128x32xf32>
    %88 = math.tanh %87 : vector<128x32xf32>
    %c2_63 = arith.constant 2 : index
    %c0_64 = arith.constant 0 : index
    %c0_65 = arith.constant 0 : index
    %89 = vector.load %arg7[%c2_63, %c0_64, %c0_65] : memref<3x128x32xf32, #tpu.memory_space<vmem>>, vector<1x128x32xf32>
    %90 = vector.shape_cast %89 : vector<1x128x32xf32> to vector<128x32xf32>
    %91 = vector.shape_cast %78 : vector<128x32xf32> to vector<1x128x32xf32>
    tpu.vector_store %arg7[%c2_63, %c0_64, %c0_65], %91 {strides = array<i32>} : memref<3x128x32xf32, #tpu.memory_space<vmem>>, vector<1x128x32xf32>,
    %c2_66 = arith.constant 2 : index
    %c0_67 = arith.constant 0 : index
    %c0_68 = arith.constant 0 : index
    %92 = vector.load %arg8[%c2_66, %c0_67, %c0_68] : memref<3x128x32xf32, #tpu.memory_space<vmem>>, vector<1x128x32xf32>
    %93 = vector.shape_cast %92 : vector<1x128x32xf32> to vector<128x32xf32>
    %94 = vector.shape_cast %88 : vector<128x32xf32> to vector<1x128x32xf32>
    tpu.vector_store %arg8[%c2_66, %c0_67, %c0_68], %94 {strides = array<i32>} : memref<3x128x32xf32, #tpu.memory_space<vmem>>, vector<1x128x32xf32>,
    return
  }
}

</mosaic_0001>

<bundles_post_ra>
// kernel: tpu_custom_call.1
= control target key start
LH: loop header
LB: loop body
LE: loop exit
PB: predicated region body
PF: predicated region fallthrough
CT: control target
= control target key end

     0   :  { %14 = vsyncpa [#allocation3], 0  ;;  %s1614_s30 = smov [#allocation2]   ;;  %s2571_s0 = inlined_call_operand.vmem [shape: f32[3], index: 0, kind: input, shape index: {}]   ;;  %s2572_s1 = inlined_call_operand.vmem [shape: f32[128,32], index: 1, kind: input, shape index: {}]   ;;  %s2573_s2 = inlined_call_operand.vmem [shape: f32[128,32], index: 2, kind: input, shape index: {}]   ;;  %s2574_s3 = inlined_call_operand.vmem [shape: f32[3,32,32], index: 3, kind: input, shape index: {}]   ;;  %s2575_s4 = inlined_call_operand.vmem [shape: f32[3,1,32], index: 4, kind: input, shape index: {}]   ;;  %s2576_s5 = inlined_call_operand.vmem [shape: f32[3,32,32], index: 5, kind: input, shape index: {}]   ;;  %s2577_s6 = inlined_call_operand.vmem [shape: f32[3,1,32], index: 6, kind: input, shape index: {}]   ;;  %s2578_s7 = inlined_call_operand.vmem [shape: f32[3,128,32], index: 7, kind: output, shape index: {0}]   ;;  %s2579_s8 = inlined_call_operand.vmem [shape: f32[3,128,32], index: 8, kind: output, shape index: {1}]  }
   0x1   :  { %s20_s29 = sshll.u32 %s2571_s0, 4  ;;  %s21_s29 = int_to_ptr.vmem [resolvable:$true] %s20_s29 }
   0x2   :  { %23 = dma.vmem_to_smem %s21_s29, 16, %s1614_s30, [#allocation3]  }
   0x3   :  { %1612 = dma.done.wait [#allocation3], 16  }
   0x4   :  { %1613 = vsyncadd [#allocation3], 4294967280 }
   0x5   :  { %40 = sfence }
   0x6   :  { %v110_v0 = vld [vmem:[%s2574_s3 + $0x18] sm:$0xff]  ;;  %v109_v2 = vld [vmem:[%s2574_s3 + $0x10] sm:$0xff]  ;;  %s73_s15 = sld [smem:[#allocation2]]  ;;  %v108_v4 = vld [vmem:[%s2574_s3 + $0x8] sm:$0xff]  ;;  %vm115_vm0 = vcmask 261120  }
   0x7   :  { %v264_v1 = vld [vmem:[%s2576_s5 + $0x18] sm:$0xff]  ;;  %176 = vmatpush.msra.mxu0 %v110_v0  ;;  %v263_v3 = vld [vmem:[%s2576_s5 + $0x10] sm:$0xff]  ;;  %v262_v5 = vld [vmem:[%s2576_s5 + $0x8] sm:$0xff]  ;;  %1393 = vmatpush.msra.mxu2 %v110_v0  ;;  %s1318_s23 = sld [smem:[#allocation2 + $0x2]] }
   0x8   :  { %329 = vmatpush.msra.mxu1 %v264_v1  ;;  %1397 = vmatpush.msra.mxu3 %v264_v1  ;;  %v107_v6 = vld [vmem:[%s2574_s3] sm:$0xff]  ;;  %v42_v13 = vld [vmem:[%s2572_s1 + $0x8] sm:$0xff]  ;;  %v43_v17 = vld [vmem:[%s2572_s1 + $0x10] sm:$0xff] }
   0x9   :  { %177 = vmatpush.msra.mxu0 %v109_v2  ;;  %v261_v7 = vld [vmem:[%s2576_s5] sm:$0xff]  ;;  %1394 = vmatpush.msra.mxu2 %v109_v2  ;;  %v58_v14 = vld [vmem:[%s2573_s2 + $0x8] sm:$0xff]  ;;  %v59_v18 = vld [vmem:[%s2573_s2 + $0x10] sm:$0xff] }
   0xa   :  { %330 = vmatpush.msra.mxu1 %v263_v3  ;;  %v41_v8 = vld [vmem:[%s2572_s1] sm:$0xff]  ;;  %1398 = vmatpush.msra.mxu3 %v263_v3  ;;  %v44_v21 = vld [vmem:[%s2572_s1 + $0x18] sm:$0xff]  ;;  %v50_v33 = vld [vmem:[%s2572_s1 + $0x48] sm:$0xff] }
   0xb   :  { %v57_v9 = vld [vmem:[%s2573_s2] sm:$0xff]  ;;  %178 = vmatpush.msra.mxu0 %v108_v4  ;;  %1395 = vmatpush.msra.mxu2 %v108_v4  ;;  %v60_v22 = vld [vmem:[%s2573_s2 + $0x18] sm:$0xff]  ;;  %v66_v34 = vld [vmem:[%s2573_s2 + $0x48] sm:$0xff] }
   0xc   :  { %331 = vmatpush.msra.mxu1 %v262_v5  ;;  %v1693_v10 = vstv %s73_s15  ;;  %1399 = vmatpush.msra.mxu3 %v262_v5  ;;  %v49_v25 = vld [vmem:[%s2572_s1 + $0x40] sm:$0xff]  ;;  %v1247_v31 = vld [vmem:[%s2574_s3 + $0x38] sm:$0xff]  ;;  %v1246_v35 = vld [vmem:[%s2574_s3 + $0x30] sm:$0xff] }
   0xd   :  { %179 = vmatpush.msra.mxu0 %v107_v6  ;;  %v75_v11 = vmul.f32 %v1693_v10, %v41_v8  ;;  %v91_v12 = vmul.f32 %v1693_v10, %v57_v9  ;;  %1396 = vmatpush.msra.mxu2 %v107_v6  ;;  %v76_v15 = vmul.f32 %v1693_v10, %v42_v13  ;;  %v65_v26 = vld [vmem:[%s2573_s2 + $0x40] sm:$0xff]  ;;  %v1268_v32 = vld [vmem:[%s2576_s5 + $0x38] sm:$0xff]  ;;  %v1267_v36 = vld [vmem:[%s2576_s5 + $0x30] sm:$0xff] }
   0xe   :  { %332 = vmatpush.msra.mxu1 %v261_v7  ;;  %1400 = vmatpush.msra.mxu3 %v261_v7  ;;  %v92_v16 = vmul.f32 %v1693_v10, %v58_v14  ;;  %v77_v19 = vmul.f32 %v1693_v10, %v43_v17  ;;  %v93_v20 = vmul.f32 %v1693_v10, %v59_v18  ;;  %v45_v27 = vld [vmem:[%s2572_s1 + $0x20] sm:$0xff]  ;;  %v46_v41 = vld [vmem:[%s2572_s1 + $0x28] sm:$0xff]  ;;  %v51_v43 = vld [vmem:[%s2572_s1 + $0x50] sm:$0xff] }
   0xf   :  { %1211 = vmatmul.msk.f32.vlgmr.msra.gmra.mxu0 %vm115_vm0, %v75_v11  ;;  %1227 = vmatmul.msk.f32.vlgmr.msra.gmra.mxu1 %vm115_vm0, %v91_v12  ;;  %v78_v23 = vmul.f32 %v1693_v10, %v44_v21  ;;  %v94_v24 = vmul.f32 %v1693_v10, %v60_v22  ;;  %v83_v28 = vmul.f32 %v1693_v10, %v49_v25  ;;  %v61_v30 = vld [vmem:[%s2573_s2 + $0x20] sm:$0xff]  ;;  %v62_v42 = vld [vmem:[%s2573_s2 + $0x28] sm:$0xff]  ;;  %v67_v44 = vld [vmem:[%s2573_s2 + $0x50] sm:$0xff] }
  0x10   :  { %v99_v29 = vmul.f32 %v1693_v10, %v65_v26  ;;  %550 = vmatpush.msrb.mxu2 %v1247_v31  ;;  %705 = vmatpush.msrb.mxu3 %v1268_v32  ;;  %v79_v37 = vmul.f32 %v1693_v10, %v45_v27  ;;  %v95_v38 = vmul.f32 %v1693_v10, %v61_v30  ;;  %v47_v49 = vld [vmem:[%s2572_s1 + $0x30] sm:$0xff]  ;;  %v1245_v51 = vld [vmem:[%s2574_s3 + $0x28] sm:$0xff]  ;;  %v52_v53 = vld [vmem:[%s2572_s1 + $0x58] sm:$0xff] }
  0x11   :  { %1219 = vmatmul.msk.f32.vlgmr.msra.gmra.mxu2 %vm115_vm0, %v83_v28  ;;  %v84_v39 = vmul.f32 %v1693_v10, %v50_v33  ;;  %v100_v40 = vmul.f32 %v1693_v10, %v66_v34  ;;  %v80_v45 = vmul.f32 %v1693_v10, %v46_v41  ;;  %v96_v46 = vmul.f32 %v1693_v10, %v62_v42  ;;  %v63_v50 = vld [vmem:[%s2573_s2 + $0x30] sm:$0xff]  ;;  %v1266_v52 = vld [vmem:[%s2576_s5 + $0x28] sm:$0xff]  ;;  %v68_v54 = vld [vmem:[%s2573_s2 + $0x58] sm:$0xff] }
  0x12   :  { %1235 = vmatmul.msk.f32.vlgmr.msra.gmra.mxu3 %vm115_vm0, %v99_v29  ;;  %551 = vmatpush.msrb.mxu2 %v1246_v35  ;;  %v85_v47 = vmul.f32 %v1693_v10, %v51_v43  ;;  %v101_v48 = vmul.f32 %v1693_v10, %v67_v44  ;;  %v81_v55 = vmul.f32 %v1693_v10, %v47_v49  ;;  %v48_v59 = vld [vmem:[%s2572_s1 + $0x38] sm:$0xff]  ;;  %v1244_v61 = vld [vmem:[%s2574_s3 + $0x20] sm:$0xff]  ;;  %v54_v5 = vld [vmem:[%s2572_s1 + $0x68] sm:$0xff] }
  0x13   :  { %706 = vmatpush.msrb.mxu3 %v1267_v36  ;;  %v97_v56 = vmul.f32 %v1693_v10, %v63_v50  ;;  %v86_v57 = vmul.f32 %v1693_v10, %v52_v53  ;;  %v102_v58 = vmul.f32 %v1693_v10, %v68_v54  ;;  %v64_v60 = vld [vmem:[%s2573_s2 + $0x38] sm:$0xff]  ;;  %v1265_v62 = vld [vmem:[%s2576_s5 + $0x20] sm:$0xff]  ;;  %v82_v1 = vmul.f32 %v1693_v10, %v48_v59  ;;  %v70_v6 = vld [vmem:[%s2573_s2 + $0x68] sm:$0xff] }
  0x14   :  { %552 = vmatpush.msrb.mxu2 %v1245_v51  ;;  %v53_v63 = vld [vmem:[%s2572_s1 + $0x60] sm:$0xff]  ;;  %v98_v2 = vmul.f32 %v1693_v10, %v64_v60  ;;  %v88_v7 = vmul.f32 %v1693_v10, %v54_v5  ;;  %v104_v8 = vmul.f32 %v1693_v10, %v70_v6  ;;  %v55_v9 = vld [vmem:[%s2572_s1 + $0x70] sm:$0xff]  ;;  %v56_v14 = vld [vmem:[%s2572_s1 + $0x78] sm:$0xff]  ;;  %s1243_s1 = sld [smem:[#allocation2 + $0x1]] }
  0x15   :  { %707 = vmatpush.msrb.mxu3 %v1266_v52  ;;  %v69_v0 = vld [vmem:[%s2573_s2 + $0x60] sm:$0xff]  ;;  %v87_v3 = vmul.f32 %v1693_v10, %v53_v63  ;;  %v71_v11 = vld [vmem:[%s2573_s2 + $0x70] sm:$0xff]  ;;  %v89_v12 = vmul.f32 %v1693_v10, %v55_v9 }
  0x16   :  { %553 = vmatpush.msrb.mxu2 %v1244_v61  ;;  %v103_v4 = vmul.f32 %v1693_v10, %v69_v0  ;;  %v105_v13 = vmul.f32 %v1693_v10, %v71_v11  ;;  %v1876_v18 = vld [vmem:[%s2575_s4] ss:$0 sm:$0xff] }
  0x17   :  { %1212 = vmatmul.msk.f32.gmra.mxu0 %vm115_vm0, %v76_v15  ;;  %1228 = vmatmul.msk.f32.gmra.mxu1 %vm115_vm0, %v92_v16  ;;  %v72_v15 = vld [vmem:[%s2573_s2 + $0x78] sm:$0xff]  ;;  %v90_v16 = vmul.f32 %v1693_v10, %v56_v14 }
  0x18   :  { %708 = vmatpush.msrb.mxu3 %v1265_v62  ;;  %v106_v17 = vmul.f32 %v1693_v10, %v72_v15 }
  0x19   :  { %1220 = vmatmul.msk.f32.gmra.mxu2 %vm115_vm0, %v84_v39 }
  0x1a   :  { %1236 = vmatmul.msk.f32.gmra.mxu3 %vm115_vm0, %v100_v40  ;;  %v1887_v29 = vstv %s1243_s1 }
  0x1f   :  { %1213 = vmatmul.msk.f32.gmra.mxu0 %vm115_vm0, %v77_v19  ;;  %1229 = vmatmul.msk.f32.gmra.mxu1 %vm115_vm0, %v93_v20  ;;  %v1881_v19 = vld [vmem:[%s2577_s6] ss:$0 sm:$0xff] }
  0x21   :  { %1221 = vmatmul.msk.f32.gmra.mxu2 %vm115_vm0, %v85_v47 }
  0x22   :  { %1237 = vmatmul.msk.f32.gmra.mxu3 %vm115_vm0, %v101_v48 }
  0x27   :  { %1214 = vmatmul.msk.f32.gmra.mxu0 %vm115_vm0, %v78_v23  ;;  %1230 = vmatmul.msk.f32.gmra.mxu1 %vm115_vm0, %v94_v24 }
  0x29   :  { %1222 = vmatmul.msk.f32.gmra.mxu2 %vm115_vm0, %v86_v57 }
  0x2a   :  { %1238 = vmatmul.msk.f32.gmra.mxu3 %vm115_vm0, %v102_v58 }
  0x2f   :  { %1215 = vmatmul.msk.f32.gmra.mxu0 %vm115_vm0, %v79_v37  ;;  %1231 = vmatmul.msk.f32.gmra.mxu1 %vm115_vm0, %v95_v38 }
  0x31   :  { %1223 = vmatmul.msk.f32.gmra.mxu2 %vm115_vm0, %v87_v3 }
  0x32   :  { %1239 = vmatmul.msk.f32.gmra.mxu3 %vm115_vm0, %v103_v4 }
  0x37   :  { %1216 = vmatmul.msk.f32.gmra.mxu0 %vm115_vm0, %v80_v45  ;;  %1232 = vmatmul.msk.f32.gmra.mxu1 %vm115_vm0, %v96_v46 }
  0x39   :  { %1224 = vmatmul.msk.f32.gmra.mxu2 %vm115_vm0, %v88_v7 }
  0x3a   :  { %1240 = vmatmul.msk.f32.gmra.mxu3 %vm115_vm0, %v104_v8 }
  0x3f   :  { %1217 = vmatmul.msk.f32.gmra.mxu0 %vm115_vm0, %v81_v55  ;;  %1233 = vmatmul.msk.f32.gmra.mxu1 %vm115_vm0, %v97_v56 }
  0x41   :  { %1225 = vmatmul.msk.f32.gmra.mxu2 %vm115_vm0, %v89_v12 }
  0x42   :  { %1241 = vmatmul.msk.f32.gmra.mxu3 %vm115_vm0, %v105_v13 }
  0x47   :  { %1218 = vmatmul.msk.f32.gmra.mxu0 %vm115_vm0, %v82_v1  ;;  %1234 = vmatmul.msk.f32.gmra.mxu1 %vm115_vm0, %v98_v2 }
  0x49   :  { %1226 = vmatmul.msk.f32.gmra.mxu2 %vm115_vm0, %v90_v16 }
  0x4a   :  { %1242 = vmatmul.msk.f32.gmra.mxu3 %vm115_vm0, %v106_v17 }
  0x8c   :  { %v181_v20 = vpop.f32.mrf.mxu0  ;;  %v334_v21 = vpop.f32.mrf.mxu1 }
  0x8d   :  { %v182_v22 = vadd.f32 %v1876_v18, %v181_v20  ;;  %v335_v10 = vadd.f32 %v1881_v19, %v334_v21 }
  0x8f   :  { %v229_v23 = vmul.f32 3.0, %v182_v22  ;;  %v382_v24 = vmul.f32 3.0, %v335_v10 }
  0x91   :  { %1408 = vtanh.f32 %v229_v23 }
  0x92   :  { %1410 = vtanh.f32 %v382_v24 }
  0x94   :  { %v184_v25 = vpop.f32.mrf.mxu0  ;;  %v337_v26 = vpop.f32.mrf.mxu1 }
  0x95   :  { %v185_v27 = vadd.f32 %v1876_v18, %v184_v25  ;;  %v338_v28 = vadd.f32 %v1881_v19, %v337_v26  ;;  %v205_v60 = vpop.f32.mrf.mxu2  ;;  %v358_v61 = vpop.f32.mrf.mxu3 }
  0x96   :  { %v206_v62 = vadd.f32 %v1876_v18, %v205_v60  ;;  %v359_v63 = vadd.f32 %v1881_v19, %v358_v61 }
  0x97   :  { %v1409_v30 = vpop.eup %1408  ;;  %v230_v31 = vmul.f32 3.0, %v185_v27  ;;  %v383_v32 = vmul.f32 3.0, %v338_v28 }
  0x98   :  { %v1411_v33 = vpop.eup %1410  ;;  %414 = vst.msk [vmem:[%s2578_s7] sm:$0xff] %vm115_vm0, %v1409_v30  ;;  %v448_v34 = vmul.f32 %v1409_v30, %v1887_v29  ;;  %v237_v5 = vmul.f32 3.0, %v206_v62  ;;  %v390_v6 = vmul.f32 3.0, %v359_v63 }
  0x99   :  { %430 = vst.msk [vmem:[%s2579_s8] sm:$0xff] %vm115_vm0, %v1411_v33  ;;  %1412 = vtanh.f32 %v230_v31  ;;  %v464_v35 = vmul.f32 %v1411_v33, %v1887_v29 }
  0x9a   :  { %1414 = vtanh.f32 %v383_v32  ;;  %1249 = vmatmul.msk.f32.vlgmr.msrb.gmra.mxu2 %vm115_vm0, %v448_v34 }
  0x9b   :  { %1270 = vmatmul.msk.f32.vlgmr.msrb.gmra.mxu3 %vm115_vm0, %v464_v35 }
  0x9c   :  { %v187_v36 = vpop.f32.mrf.mxu0  ;;  %v340_v37 = vpop.f32.mrf.mxu1 }
  0x9d   :  { %v188_v38 = vadd.f32 %v1876_v18, %v187_v36  ;;  %v341_v39 = vadd.f32 %v1881_v19, %v340_v37  ;;  %v208_v13 = vpop.f32.mrf.mxu2  ;;  %v361_v14 = vpop.f32.mrf.mxu3 }
  0x9e   :  { %v209_v15 = vadd.f32 %v1876_v18, %v208_v13  ;;  %v362_v16 = vadd.f32 %v1881_v19, %v361_v14 }
  0x9f   :  { %v1413_v40 = vpop.eup %1412  ;;  %v231_v41 = vmul.f32 3.0, %v188_v38  ;;  %v384_v42 = vmul.f32 3.0, %v341_v39 }
  0xa0   :  { %v1415_v43 = vpop.eup %1414  ;;  %415 = vst.msk [vmem:[%s2578_s7 + $0x8] sm:$0xff] %vm115_vm0, %v1413_v40  ;;  %v449_v44 = vmul.f32 %v1413_v40, %v1887_v29  ;;  %v238_v23 = vmul.f32 3.0, %v209_v15  ;;  %v391_v24 = vmul.f32 3.0, %v362_v16 }
  0xa1   :  { %431 = vst.msk [vmem:[%s2579_s8 + $0x8] sm:$0xff] %vm115_vm0, %v1415_v43  ;;  %1416 = vtanh.f32 %v231_v41  ;;  %v465_v45 = vmul.f32 %v1415_v43, %v1887_v29 }
  0xa2   :  { %1418 = vtanh.f32 %v384_v42  ;;  %1250 = vmatmul.msk.f32.gmra.mxu2 %vm115_vm0, %v449_v44 }
  0xa3   :  { %1271 = vmatmul.msk.f32.gmra.mxu3 %vm115_vm0, %v465_v45 }
  0xa4   :  { %v190_v46 = vpop.f32.mrf.mxu0  ;;  %v343_v47 = vpop.f32.mrf.mxu1 }
  0xa5   :  { %v191_v48 = vadd.f32 %v1876_v18, %v190_v46  ;;  %v344_v49 = vadd.f32 %v1881_v19, %v343_v47  ;;  %v211_v33 = vpop.f32.mrf.mxu2  ;;  %v364_v34 = vpop.f32.mrf.mxu3 }
  0xa6   :  { %v212_v35 = vadd.f32 %v1876_v18, %v211_v33  ;;  %v365_v36 = vadd.f32 %v1881_v19, %v364_v34 }
  0xa7   :  { %v1417_v50 = vpop.eup %1416  ;;  %v232_v51 = vmul.f32 3.0, %v191_v48  ;;  %v385_v52 = vmul.f32 3.0, %v344_v49 }
  0xa8   :  { %v1419_v53 = vpop.eup %1418  ;;  %416 = vst.msk [vmem:[%s2578_s7 + $0x10] sm:$0xff] %vm115_vm0, %v1417_v50  ;;  %v450_v54 = vmul.f32 %v1417_v50, %v1887_v29  ;;  %v239_v42 = vmul.f32 3.0, %v212_v35  ;;  %v392_v43 = vmul.f32 3.0, %v365_v36 }
  0xa9   :  { %432 = vst.msk [vmem:[%s2579_s8 + $0x10] sm:$0xff] %vm115_vm0, %v1419_v53  ;;  %1420 = vtanh.f32 %v232_v51  ;;  %v466_v55 = vmul.f32 %v1419_v53, %v1887_v29 }
  0xaa   :  { %1422 = vtanh.f32 %v385_v52  ;;  %1251 = vmatmul.msk.f32.gmra.mxu2 %vm115_vm0, %v450_v54 }
  0xab   :  { %1272 = vmatmul.msk.f32.gmra.mxu3 %vm115_vm0, %v466_v55 }
  0xac   :  { %v193_v56 = vpop.f32.mrf.mxu0  ;;  %v346_v57 = vpop.f32.mrf.mxu1 }
  0xad   :  { %v194_v58 = vadd.f32 %v1876_v18, %v193_v56  ;;  %v347_v59 = vadd.f32 %v1881_v19, %v346_v57  ;;  %v214_v51 = vpop.f32.mrf.mxu2  ;;  %v367_v52 = vpop.f32.mrf.mxu3 }
  0xae   :  { %v215_v53 = vadd.f32 %v1876_v18, %v214_v51  ;;  %v368_v54 = vadd.f32 %v1881_v19, %v367_v52 }
  0xaf   :  { %v1421_v0 = vpop.eup %1420  ;;  %v233_v1 = vmul.f32 3.0, %v194_v58  ;;  %v386_v2 = vmul.f32 3.0, %v347_v59 }
  0xb0   :  { %v1423_v3 = vpop.eup %1422  ;;  %417 = vst.msk [vmem:[%s2578_s7 + $0x18] sm:$0xff] %vm115_vm0, %v1421_v0  ;;  %v451_v4 = vmul.f32 %v1421_v0, %v1887_v29  ;;  %v240_v60 = vmul.f32 3.0, %v215_v53  ;;  %v393_v61 = vmul.f32 3.0, %v368_v54  ;;  %v1319_v54 = vld [vmem:[%s2574_s3 + $0x40] sm:$0xff] }
  0xb1   :  { %433 = vst.msk [vmem:[%s2579_s8 + $0x18] sm:$0xff] %vm115_vm0, %v1423_v3  ;;  %1424 = vtanh.f32 %v233_v1  ;;  %v467_v7 = vmul.f32 %v1423_v3, %v1887_v29  ;;  %v1322_v1 = vld [vmem:[%s2574_s3 + $0x58] sm:$0xff] }
  0xb2   :  { %1426 = vtanh.f32 %v386_v2  ;;  %1252 = vmatmul.msk.f32.gmra.mxu2 %vm115_vm0, %v451_v4  ;;  %v1343_v2 = vld [vmem:[%s2576_s5 + $0x58] sm:$0xff]  ;;  %928 = vmatpush.msrb.mxu0 %v1322_v1  ;;  %v2173_v1 = vld [vmem:[%s2577_s6 + $0x1] ss:$0 sm:$0xff] }
  0xb3   :  { %1273 = vmatmul.msk.f32.gmra.mxu3 %vm115_vm0, %v467_v7  ;;  %1428 = vtanh.f32 %v237_v5  ;;  %1083 = vmatpush.msrb.mxu1 %v1343_v2 }
  0xb4   :  { %v196_v8 = vpop.f32.mrf.mxu0  ;;  %v349_v9 = vpop.f32.mrf.mxu1  ;;  %1430 = vtanh.f32 %v390_v6 }
  0xb5   :  { %v197_v11 = vadd.f32 %v1876_v18, %v196_v8  ;;  %v350_v12 = vadd.f32 %v1881_v19, %v349_v9  ;;  %v217_v3 = vpop.f32.mrf.mxu2  ;;  %v370_v4 = vpop.f32.mrf.mxu3 }
  0xb6   :  { %v218_v5 = vadd.f32 %v1876_v18, %v217_v3  ;;  %v371_v6 = vadd.f32 %v1881_v19, %v370_v4 }
  0xb7   :  { %v1425_v17 = vpop.eup %1424  ;;  %v234_v20 = vmul.f32 3.0, %v197_v11  ;;  %v387_v21 = vmul.f32 3.0, %v350_v12 }
  0xb8   :  { %v1427_v22 = vpop.eup %1426  ;;  %418 = vst.msk [vmem:[%s2578_s7 + $0x20] sm:$0xff] %vm115_vm0, %v1425_v17  ;;  %v452_v10 = vmul.f32 %v1425_v17, %v1887_v29  ;;  %v241_v11 = vmul.f32 3.0, %v218_v5  ;;  %v394_v12 = vmul.f32 3.0, %v371_v6 }
  0xb9   :  { %v1954_v25 = vpop.eup %1428  ;;  %434 = vst.msk [vmem:[%s2579_s8 + $0x20] sm:$0xff] %vm115_vm0, %v1427_v22  ;;  %1432 = vtanh.f32 %v234_v20  ;;  %v468_v26 = vmul.f32 %v1427_v22, %v1887_v29 }
  0xba   :  { %v1961_v27 = vpop.eup %1430  ;;  %1434 = vtanh.f32 %v387_v21  ;;  %1253 = vmatmul.msk.f32.gmra.mxu2 %vm115_vm0, %v452_v10  ;;  %422 = vst.msk [vmem:[%s2578_s7 + $0x40] sm:$0xff] %vm115_vm0, %v1954_v25  ;;  %v456_v20 = vmul.f32 %v1954_v25, %v1887_v29  ;;  %v1321_v25 = vld [vmem:[%s2574_s3 + $0x50] sm:$0xff] }
  0xbb   :  { %1274 = vmatmul.msk.f32.gmra.mxu3 %vm115_vm0, %v468_v26  ;;  %438 = vst.msk [vmem:[%s2579_s8 + $0x40] sm:$0xff] %vm115_vm0, %v1961_v27  ;;  %1436 = vtanh.f32 %v238_v23  ;;  %v472_v10 = vmul.f32 %v1961_v27, %v1887_v29  ;;  %v1342_v27 = vld [vmem:[%s2576_s5 + $0x50] sm:$0xff]  ;;  %929 = vmatpush.msrb.mxu0 %v1321_v25 }
  0xbc   :  { %v199_v28 = vpop.f32.mrf.mxu0  ;;  %v352_v30 = vpop.f32.mrf.mxu1  ;;  %1438 = vtanh.f32 %v391_v24  ;;  %1084 = vmatpush.msrb.mxu1 %v1342_v27 }
  0xbd   :  { %v200_v31 = vadd.f32 %v1876_v18, %v199_v28  ;;  %v353_v32 = vadd.f32 %v1881_v19, %v352_v30  ;;  %v220_v16 = vpop.f32.mrf.mxu2  ;;  %v373_v17 = vpop.f32.mrf.mxu3 }
  0xbe   :  { %v221_v21 = vadd.f32 %v1876_v18, %v220_v16  ;;  %v374_v22 = vadd.f32 %v1881_v19, %v373_v17 }
  0xbf   :  { %v1433_v37 = vpop.eup %1432  ;;  %v235_v38 = vmul.f32 3.0, %v200_v31  ;;  %v388_v39 = vmul.f32 3.0, %v353_v32 }
  0xc0   :  { %v1435_v40 = vpop.eup %1434  ;;  %419 = vst.msk [vmem:[%s2578_s7 + $0x28] sm:$0xff] %vm115_vm0, %v1433_v37  ;;  %v453_v41 = vmul.f32 %v1433_v37, %v1887_v29  ;;  %v242_v24 = vmul.f32 3.0, %v221_v21  ;;  %v395_v26 = vmul.f32 3.0, %v374_v22 }
  0xc1   :  { %v1984_v44 = vpop.eup %1436  ;;  %435 = vst.msk [vmem:[%s2579_s8 + $0x28] sm:$0xff] %vm115_vm0, %v1435_v40  ;;  %1440 = vtanh.f32 %v235_v38  ;;  %v469_v45 = vmul.f32 %v1435_v40, %v1887_v29 }
  0xc2   :  { %v1991_v46 = vpop.eup %1438  ;;  %1442 = vtanh.f32 %v388_v39  ;;  %1254 = vmatmul.msk.f32.gmra.mxu2 %vm115_vm0, %v453_v41  ;;  %423 = vst.msk [vmem:[%s2578_s7 + $0x48] sm:$0xff] %vm115_vm0, %v1984_v44  ;;  %v457_v32 = vmul.f32 %v1984_v44, %v1887_v29 }
  0xc3   :  { %1275 = vmatmul.msk.f32.gmra.mxu3 %vm115_vm0, %v469_v45  ;;  %439 = vst.msk [vmem:[%s2579_s8 + $0x48] sm:$0xff] %vm115_vm0, %v1991_v46  ;;  %1444 = vtanh.f32 %v239_v42  ;;  %v473_v35 = vmul.f32 %v1991_v46, %v1887_v29 }
  0xc4   :  { %v202_v47 = vpop.f32.mrf.mxu0  ;;  %v355_v48 = vpop.f32.mrf.mxu1  ;;  %1446 = vtanh.f32 %v392_v43 }
  0xc5   :  { %v203_v49 = vadd.f32 %v1876_v18, %v202_v47  ;;  %v356_v50 = vadd.f32 %v1881_v19, %v355_v48  ;;  %v223_v30 = vpop.f32.mrf.mxu2  ;;  %v376_v31 = vpop.f32.mrf.mxu3 }
  0xc6   :  { %v224_v33 = vadd.f32 %v1876_v18, %v223_v30  ;;  %v377_v34 = vadd.f32 %v1881_v19, %v376_v31 }
  0xc7   :  { %v1441_v55 = vpop.eup %1440  ;;  %v236_v56 = vmul.f32 3.0, %v203_v49  ;;  %v389_v57 = vmul.f32 3.0, %v356_v50 }
  0xc8   :  { %v1443_v58 = vpop.eup %1442  ;;  %420 = vst.msk [vmem:[%s2578_s7 + $0x30] sm:$0xff] %vm115_vm0, %v1441_v55  ;;  %v454_v59 = vmul.f32 %v1441_v55, %v1887_v29  ;;  %v243_v37 = vmul.f32 3.0, %v224_v33  ;;  %v396_v38 = vmul.f32 3.0, %v377_v34  ;;  %v1340_v55 = vld [vmem:[%s2576_s5 + $0x40] sm:$0xff] }
  0xc9   :  { %v2014_v62 = vpop.eup %1444  ;;  %436 = vst.msk [vmem:[%s2579_s8 + $0x30] sm:$0xff] %vm115_vm0, %v1443_v58  ;;  %1448 = vtanh.f32 %v236_v56  ;;  %v470_v63 = vmul.f32 %v1443_v58, %v1887_v29 }
  0xca   :  { %v2021_v0 = vpop.eup %1446  ;;  %1450 = vtanh.f32 %v389_v57  ;;  %1255 = vmatmul.msk.f32.gmra.mxu2 %vm115_vm0, %v454_v59  ;;  %424 = vst.msk [vmem:[%s2578_s7 + $0x50] sm:$0xff] %vm115_vm0, %v2014_v62  ;;  %v458_v42 = vmul.f32 %v2014_v62, %v1887_v29 }
  0xcb   :  { %1276 = vmatmul.msk.f32.gmra.mxu3 %vm115_vm0, %v470_v63  ;;  %440 = vst.msk [vmem:[%s2579_s8 + $0x50] sm:$0xff] %vm115_vm0, %v2021_v0  ;;  %1452 = vtanh.f32 %v240_v60  ;;  %v474_v45 = vmul.f32 %v2021_v0, %v1887_v29  ;;  %v2168_v0 = vld [vmem:[%s2575_s4 + $0x1] ss:$0 sm:$0xff] }
  0xcc   :  { %1454 = vtanh.f32 %v393_v61 }
  0xcd   :  { %1456 = vtanh.f32 %v241_v11  ;;  %v226_v40 = vpop.f32.mrf.mxu2  ;;  %v379_v41 = vpop.f32.mrf.mxu3  ;;  %v2178_v11 = vstv %s1318_s23 }
  0xce   :  { %1458 = vtanh.f32 %v394_v12  ;;  %v227_v43 = vadd.f32 %v1876_v18, %v226_v40  ;;  %v380_v44 = vadd.f32 %v1881_v19, %v379_v41  ;;  %v1320_v18 = vld [vmem:[%s2574_s3 + $0x48] sm:$0xff] }
  0xcf   :  { %v1449_v7 = vpop.eup %1448  ;;  %1460 = vtanh.f32 %v242_v24  ;;  %v1341_v19 = vld [vmem:[%s2576_s5 + $0x48] sm:$0xff]  ;;  %930 = vmatpush.msrb.mxu0 %v1320_v18 }
  0xd0   :  { %v1451_v8 = vpop.eup %1450  ;;  %421 = vst.msk [vmem:[%s2578_s7 + $0x38] sm:$0xff] %vm115_vm0, %v1449_v7  ;;  %v455_v9 = vmul.f32 %v1449_v7, %v1887_v29  ;;  %1462 = vtanh.f32 %v395_v26  ;;  %v244_v47 = vmul.f32 3.0, %v227_v43  ;;  %v397_v48 = vmul.f32 3.0, %v380_v44  ;;  %1085 = vmatpush.msrb.mxu1 %v1341_v19 }
  0xd1   :  { %v2048_v13 = vpop.eup %1452  ;;  %437 = vst.msk [vmem:[%s2579_s8 + $0x38] sm:$0xff] %vm115_vm0, %v1451_v8  ;;  %v471_v14 = vmul.f32 %v1451_v8, %v1887_v29  ;;  %1464 = vtanh.f32 %v243_v37  ;;  %931 = vmatpush.msrb.mxu0 %v1319_v54 }
  0xd2   :  { %v2055_v15 = vpop.eup %1454  ;;  %1256 = vmatmul.msk.f32.gmra.mxu2 %vm115_vm0, %v455_v9  ;;  %425 = vst.msk [vmem:[%s2578_s7 + $0x58] sm:$0xff] %vm115_vm0, %v2048_v13  ;;  %1466 = vtanh.f32 %v396_v38  ;;  %v459_v50 = vmul.f32 %v2048_v13, %v1887_v29  ;;  %1086 = vmatpush.msrb.mxu1 %v1340_v55 }
  0xd3   :  { %1277 = vmatmul.msk.f32.gmra.mxu3 %vm115_vm0, %v471_v14  ;;  %441 = vst.msk [vmem:[%s2579_s8 + $0x58] sm:$0xff] %vm115_vm0, %v2055_v15  ;;  %v1457_v23 = vpop.eup %1456  ;;  %1468 = vtanh.f32 %v244_v47  ;;  %v475_v51 = vmul.f32 %v2055_v15, %v1887_v29 }
  0xd4   :  { %v1459_v28 = vpop.eup %1458  ;;  %426 = vst.msk [vmem:[%s2578_s7 + $0x60] sm:$0xff] %vm115_vm0, %v1457_v23  ;;  %1470 = vtanh.f32 %v397_v48  ;;  %v460_v56 = vmul.f32 %v1457_v23, %v1887_v29 }
  0xd5   :  { %442 = vst.msk [vmem:[%s2579_s8 + $0x60] sm:$0xff] %vm115_vm0, %v1459_v28  ;;  %v1461_v36 = vpop.eup %1460  ;;  %v476_v57 = vmul.f32 %v1459_v28, %v1887_v29 }
  0xd6   :  { %v1463_v39 = vpop.eup %1462  ;;  %427 = vst.msk [vmem:[%s2578_s7 + $0x68] sm:$0xff] %vm115_vm0, %v1461_v36  ;;  %v461_v58 = vmul.f32 %v1461_v36, %v1887_v29 }
  0xd7   :  { %443 = vst.msk [vmem:[%s2579_s8 + $0x68] sm:$0xff] %vm115_vm0, %v1463_v39  ;;  %v1465_v46 = vpop.eup %1464  ;;  %v477_v59 = vmul.f32 %v1463_v39, %v1887_v29 }
  0xd8   :  { %v1467_v49 = vpop.eup %1466  ;;  %428 = vst.msk [vmem:[%s2578_s7 + $0x70] sm:$0xff] %vm115_vm0, %v1465_v46  ;;  %v462_v60 = vmul.f32 %v1465_v46, %v1887_v29 }
  0xd9   :  { %444 = vst.msk [vmem:[%s2579_s8 + $0x70] sm:$0xff] %vm115_vm0, %v1467_v49  ;;  %v1469_v52 = vpop.eup %1468  ;;  %v478_v61 = vmul.f32 %v1467_v49, %v1887_v29 }
  0xda   :  { %1257 = vmatmul.msk.f32.gmra.mxu2 %vm115_vm0, %v456_v20  ;;  %v1471_v53 = vpop.eup %1470  ;;  %429 = vst.msk [vmem:[%s2578_s7 + $0x78] sm:$0xff] %vm115_vm0, %v1469_v52  ;;  %v463_v62 = vmul.f32 %v1469_v52, %v1887_v29 }
  0xdb   :  { %1278 = vmatmul.msk.f32.gmra.mxu3 %vm115_vm0, %v472_v10  ;;  %445 = vst.msk [vmem:[%s2579_s8 + $0x78] sm:$0xff] %vm115_vm0, %v1471_v53  ;;  %v479_v63 = vmul.f32 %v1471_v53, %v1887_v29 }
  0xe2   :  { %1258 = vmatmul.msk.f32.gmra.mxu2 %vm115_vm0, %v457_v32 }
  0xe3   :  { %1279 = vmatmul.msk.f32.gmra.mxu3 %vm115_vm0, %v473_v35 }
  0xea   :  { %1259 = vmatmul.msk.f32.gmra.mxu2 %vm115_vm0, %v458_v42 }
  0xeb   :  { %1280 = vmatmul.msk.f32.gmra.mxu3 %vm115_vm0, %v474_v45 }
  0xf2   :  { %1260 = vmatmul.msk.f32.gmra.mxu2 %vm115_vm0, %v459_v50 }
  0xf3   :  { %1281 = vmatmul.msk.f32.gmra.mxu3 %vm115_vm0, %v475_v51 }
  0xfa   :  { %1261 = vmatmul.msk.f32.gmra.mxu2 %vm115_vm0, %v460_v56 }
  0xfb   :  { %1282 = vmatmul.msk.f32.gmra.mxu3 %vm115_vm0, %v476_v57 }
 0x102   :  { %1262 = vmatmul.msk.f32.gmra.mxu2 %vm115_vm0, %v461_v58 }
 0x103   :  { %1283 = vmatmul.msk.f32.gmra.mxu3 %vm115_vm0, %v477_v59 }
 0x10a   :  { %1263 = vmatmul.msk.f32.gmra.mxu2 %vm115_vm0, %v462_v60 }
 0x10b   :  { %1284 = vmatmul.msk.f32.gmra.mxu3 %vm115_vm0, %v478_v61 }
 0x112   :  { %1264 = vmatmul.msk.f32.gmra.mxu2 %vm115_vm0, %v463_v62 }
 0x113   :  { %1285 = vmatmul.msk.f32.gmra.mxu3 %vm115_vm0, %v479_v63 }
 0x11d   :  { %v555_v2 = vpop.f32.mrf.mxu2 }
 0x11e   :  { %v556_v3 = vadd.f32 %v2168_v0, %v555_v2  ;;  %v710_v4 = vpop.f32.mrf.mxu3 }
 0x11f   :  { %v711_v29 = vadd.f32 %v2173_v1, %v710_v4 }
 0x120   :  { %v603_v5 = vmul.f32 3.0, %v556_v3 }
 0x121   :  { %v758_v6 = vmul.f32 3.0, %v711_v29 }
 0x122   :  { %1472 = vtanh.f32 %v603_v5 }
 0x123   :  { %1474 = vtanh.f32 %v758_v6 }
 0x125   :  { %v558_v7 = vpop.f32.mrf.mxu2 }
 0x126   :  { %v559_v8 = vadd.f32 %v2168_v0, %v558_v7  ;;  %v713_v9 = vpop.f32.mrf.mxu3 }
 0x127   :  { %v714_v12 = vadd.f32 %v2173_v1, %v713_v9 }
 0x128   :  { %v1473_v13 = vpop.eup %1472  ;;  %v604_v14 = vmul.f32 3.0, %v559_v8 }
 0x129   :  { %v1475_v15 = vpop.eup %1474  ;;  %1286 = vst.msk [vmem:[%s2578_s7 + $0x80] sm:$0xff] %vm115_vm0, %v1473_v13  ;;  %v759_v16 = vmul.f32 3.0, %v714_v12  ;;  %v826_v17 = vmul.f32 %v1473_v13, %v2178_v11 }
 0x12a   :  { %1302 = vst.msk [vmem:[%s2579_s8 + $0x80] sm:$0xff] %vm115_vm0, %v1475_v15  ;;  %1476 = vtanh.f32 %v604_v14  ;;  %v842_v20 = vmul.f32 %v1475_v15, %v2178_v11 }
 0x12b   :  { %1478 = vtanh.f32 %v759_v16  ;;  %1324 = vmatmul.msk.f32.vlgmr.msrb.gmra.mxu0 %vm115_vm0, %v826_v17 }
 0x12c   :  { %1345 = vmatmul.msk.f32.vlgmr.msrb.gmra.mxu1 %vm115_vm0, %v842_v20 }
 0x12d   :  { %v561_v21 = vpop.f32.mrf.mxu2 }
 0x12e   :  { %v562_v22 = vadd.f32 %v2168_v0, %v561_v21  ;;  %v716_v10 = vpop.f32.mrf.mxu3 }
 0x12f   :  { %v717_v23 = vadd.f32 %v2173_v1, %v716_v10 }
 0x130   :  { %v1477_v24 = vpop.eup %1476  ;;  %v605_v26 = vmul.f32 3.0, %v562_v22 }
 0x131   :  { %v1479_v28 = vpop.eup %1478  ;;  %1287 = vst.msk [vmem:[%s2578_s7 + $0x88] sm:$0xff] %vm115_vm0, %v1477_v24  ;;  %v760_v25 = vmul.f32 3.0, %v717_v23  ;;  %v827_v27 = vmul.f32 %v1477_v24, %v2178_v11 }
 0x132   :  { %1303 = vst.msk [vmem:[%s2579_s8 + $0x88] sm:$0xff] %vm115_vm0, %v1479_v28  ;;  %1480 = vtanh.f32 %v605_v26  ;;  %v843_v30 = vmul.f32 %v1479_v28, %v2178_v11 }
 0x133   :  { %1482 = vtanh.f32 %v760_v25  ;;  %1325 = vmatmul.msk.f32.gmra.mxu0 %vm115_vm0, %v827_v27 }
 0x134   :  { %1346 = vmatmul.msk.f32.gmra.mxu1 %vm115_vm0, %v843_v30 }
 0x135   :  { %v564_v31 = vpop.f32.mrf.mxu2 }
 0x136   :  { %v565_v32 = vadd.f32 %v2168_v0, %v564_v31  ;;  %v719_v33 = vpop.f32.mrf.mxu3 }
 0x137   :  { %v720_v34 = vadd.f32 %v2173_v1, %v719_v33 }
 0x138   :  { %v1481_v35 = vpop.eup %1480  ;;  %v606_v36 = vmul.f32 3.0, %v565_v32 }
 0x139   :  { %v1483_v37 = vpop.eup %1482  ;;  %1288 = vst.msk [vmem:[%s2578_s7 + $0x90] sm:$0xff] %vm115_vm0, %v1481_v35  ;;  %v761_v38 = vmul.f32 3.0, %v720_v34  ;;  %v828_v39 = vmul.f32 %v1481_v35, %v2178_v11 }
 0x13a   :  { %1304 = vst.msk [vmem:[%s2579_s8 + $0x90] sm:$0xff] %vm115_vm0, %v1483_v37  ;;  %1484 = vtanh.f32 %v606_v36  ;;  %v844_v40 = vmul.f32 %v1483_v37, %v2178_v11 }
 0x13b   :  { %1486 = vtanh.f32 %v761_v38  ;;  %1326 = vmatmul.msk.f32.gmra.mxu0 %vm115_vm0, %v828_v39 }
 0x13c   :  { %1347 = vmatmul.msk.f32.gmra.mxu1 %vm115_vm0, %v844_v40 }
 0x13d   :  { %v567_v41 = vpop.f32.mrf.mxu2 }
 0x13e   :  { %v568_v42 = vadd.f32 %v2168_v0, %v567_v41  ;;  %v722_v43 = vpop.f32.mrf.mxu3 }
 0x13f   :  { %v723_v44 = vadd.f32 %v2173_v1, %v722_v43 }
 0x140   :  { %v1485_v45 = vpop.eup %1484  ;;  %v607_v46 = vmul.f32 3.0, %v568_v42 }
 0x141   :  { %v1487_v47 = vpop.eup %1486  ;;  %1289 = vst.msk [vmem:[%s2578_s7 + $0x98] sm:$0xff] %vm115_vm0, %v1485_v45  ;;  %v762_v48 = vmul.f32 3.0, %v723_v44  ;;  %v829_v49 = vmul.f32 %v1485_v45, %v2178_v11 }
 0x142   :  { %1305 = vst.msk [vmem:[%s2579_s8 + $0x98] sm:$0xff] %vm115_vm0, %v1487_v47  ;;  %1488 = vtanh.f32 %v607_v46  ;;  %v845_v18 = vmul.f32 %v1487_v47, %v2178_v11 }
 0x143   :  { %1490 = vtanh.f32 %v762_v48  ;;  %1327 = vmatmul.msk.f32.gmra.mxu0 %vm115_vm0, %v829_v49 }
 0x144   :  { %1348 = vmatmul.msk.f32.gmra.mxu1 %vm115_vm0, %v845_v18 }
 0x145   :  { %v570_v19 = vpop.f32.mrf.mxu2 }
 0x146   :  { %v571_v50 = vadd.f32 %v2168_v0, %v570_v19  ;;  %v725_v51 = vpop.f32.mrf.mxu3 }
 0x147   :  { %v726_v52 = vadd.f32 %v2173_v1, %v725_v51 }
 0x148   :  { %v1489_v53 = vpop.eup %1488  ;;  %v608_v54 = vmul.f32 3.0, %v571_v50 }
 0x149   :  { %v1491_v55 = vpop.eup %1490  ;;  %1290 = vst.msk [vmem:[%s2578_s7 + $0xa0] sm:$0xff] %vm115_vm0, %v1489_v53  ;;  %v763_v56 = vmul.f32 3.0, %v726_v52  ;;  %v830_v57 = vmul.f32 %v1489_v53, %v2178_v11 }
 0x14a   :  { %1306 = vst.msk [vmem:[%s2579_s8 + $0xa0] sm:$0xff] %vm115_vm0, %v1491_v55  ;;  %1492 = vtanh.f32 %v608_v54  ;;  %v846_v58 = vmul.f32 %v1491_v55, %v2178_v11 }
 0x14b   :  { %1494 = vtanh.f32 %v763_v56  ;;  %1328 = vmatmul.msk.f32.gmra.mxu0 %vm115_vm0, %v830_v57 }
 0x14c   :  { %1349 = vmatmul.msk.f32.gmra.mxu1 %vm115_vm0, %v846_v58 }
 0x14d   :  { %v573_v59 = vpop.f32.mrf.mxu2 }
 0x14e   :  { %v574_v60 = vadd.f32 %v2168_v0, %v573_v59  ;;  %v728_v61 = vpop.f32.mrf.mxu3 }
 0x14f   :  { %v729_v62 = vadd.f32 %v2173_v1, %v728_v61 }
 0x150   :  { %v1493_v63 = vpop.eup %1492  ;;  %v609_v2 = vmul.f32 3.0, %v574_v60 }
 0x151   :  { %v1495_v3 = vpop.eup %1494  ;;  %1291 = vst.msk [vmem:[%s2578_s7 + $0xa8] sm:$0xff] %vm115_vm0, %v1493_v63  ;;  %v764_v4 = vmul.f32 3.0, %v729_v62  ;;  %v831_v29 = vmul.f32 %v1493_v63, %v2178_v11 }
 0x152   :  { %1307 = vst.msk [vmem:[%s2579_s8 + $0xa8] sm:$0xff] %vm115_vm0, %v1495_v3  ;;  %1496 = vtanh.f32 %v609_v2  ;;  %v847_v5 = vmul.f32 %v1495_v3, %v2178_v11 }
 0x153   :  { %1498 = vtanh.f32 %v764_v4  ;;  %1329 = vmatmul.msk.f32.gmra.mxu0 %vm115_vm0, %v831_v29 }
 0x154   :  { %1350 = vmatmul.msk.f32.gmra.mxu1 %vm115_vm0, %v847_v5 }
 0x155   :  { %v576_v6 = vpop.f32.mrf.mxu2 }
 0x156   :  { %v577_v7 = vadd.f32 %v2168_v0, %v576_v6  ;;  %v731_v8 = vpop.f32.mrf.mxu3 }
 0x157   :  { %v732_v9 = vadd.f32 %v2173_v1, %v731_v8 }
 0x158   :  { %v1497_v12 = vpop.eup %1496  ;;  %v610_v13 = vmul.f32 3.0, %v577_v7 }
 0x159   :  { %v1499_v14 = vpop.eup %1498  ;;  %1292 = vst.msk [vmem:[%s2578_s7 + $0xb0] sm:$0xff] %vm115_vm0, %v1497_v12  ;;  %v765_v15 = vmul.f32 3.0, %v732_v9  ;;  %v832_v16 = vmul.f32 %v1497_v12, %v2178_v11 }
 0x15a   :  { %1308 = vst.msk [vmem:[%s2579_s8 + $0xb0] sm:$0xff] %vm115_vm0, %v1499_v14  ;;  %1500 = vtanh.f32 %v610_v13  ;;  %v848_v17 = vmul.f32 %v1499_v14, %v2178_v11 }
 0x15b   :  { %1502 = vtanh.f32 %v765_v15  ;;  %1330 = vmatmul.msk.f32.gmra.mxu0 %vm115_vm0, %v832_v16 }
 0x15c   :  { %1351 = vmatmul.msk.f32.gmra.mxu1 %vm115_vm0, %v848_v17 }
 0x15d   :  { %v579_v20 = vpop.f32.mrf.mxu2 }
 0x15e   :  { %v580_v21 = vadd.f32 %v2168_v0, %v579_v20  ;;  %v734_v22 = vpop.f32.mrf.mxu3 }
 0x15f   :  { %v735_v10 = vadd.f32 %v2173_v1, %v734_v22 }
 0x160   :  { %v1501_v23 = vpop.eup %1500  ;;  %v611_v24 = vmul.f32 3.0, %v580_v21 }
 0x161   :  { %v1503_v26 = vpop.eup %1502  ;;  %1293 = vst.msk [vmem:[%s2578_s7 + $0xb8] sm:$0xff] %vm115_vm0, %v1501_v23  ;;  %v766_v28 = vmul.f32 3.0, %v735_v10  ;;  %v833_v25 = vmul.f32 %v1501_v23, %v2178_v11 }
 0x162   :  { %1309 = vst.msk [vmem:[%s2579_s8 + $0xb8] sm:$0xff] %vm115_vm0, %v1503_v26  ;;  %1504 = vtanh.f32 %v611_v24  ;;  %v849_v27 = vmul.f32 %v1503_v26, %v2178_v11 }
 0x163   :  { %1506 = vtanh.f32 %v766_v28  ;;  %1331 = vmatmul.msk.f32.gmra.mxu0 %vm115_vm0, %v833_v25 }
 0x164   :  { %1352 = vmatmul.msk.f32.gmra.mxu1 %vm115_vm0, %v849_v27 }
 0x165   :  { %v582_v30 = vpop.f32.mrf.mxu2 }
 0x166   :  { %v583_v31 = vadd.f32 %v2168_v0, %v582_v30  ;;  %v737_v32 = vpop.f32.mrf.mxu3 }
 0x167   :  { %v738_v33 = vadd.f32 %v2173_v1, %v737_v32 }
 0x168   :  { %v1505_v34 = vpop.eup %1504  ;;  %v612_v35 = vmul.f32 3.0, %v583_v31 }
 0x169   :  { %v1507_v36 = vpop.eup %1506  ;;  %1294 = vst.msk [vmem:[%s2578_s7 + $0xc0] sm:$0xff] %vm115_vm0, %v1505_v34  ;;  %v767_v37 = vmul.f32 3.0, %v738_v33  ;;  %v834_v38 = vmul.f32 %v1505_v34, %v2178_v11 }
 0x16a   :  { %1310 = vst.msk [vmem:[%s2579_s8 + $0xc0] sm:$0xff] %vm115_vm0, %v1507_v36  ;;  %1508 = vtanh.f32 %v612_v35  ;;  %v850_v39 = vmul.f32 %v1507_v36, %v2178_v11 }
 0x16b   :  { %1510 = vtanh.f32 %v767_v37  ;;  %1332 = vmatmul.msk.f32.gmra.mxu0 %vm115_vm0, %v834_v38 }
 0x16c   :  { %1353 = vmatmul.msk.f32.gmra.mxu1 %vm115_vm0, %v850_v39 }
 0x16d   :  { %v585_v40 = vpop.f32.mrf.mxu2 }
 0x16e   :  { %v586_v41 = vadd.f32 %v2168_v0, %v585_v40  ;;  %v740_v42 = vpop.f32.mrf.mxu3 }
 0x16f   :  { %v741_v43 = vadd.f32 %v2173_v1, %v740_v42  ;;  %v2409_v42 = vld [vmem:[%s2577_s6 + $0x2] ss:$0 sm:$0xff] }
 0x170   :  { %v1509_v44 = vpop.eup %1508  ;;  %v613_v45 = vmul.f32 3.0, %v586_v41  ;;  %v2404_v41 = vld [vmem:[%s2575_s4 + $0x2] ss:$0 sm:$0xff] }
 0x171   :  { %v1511_v46 = vpop.eup %1510  ;;  %1295 = vst.msk [vmem:[%s2578_s7 + $0xc8] sm:$0xff] %vm115_vm0, %v1509_v44  ;;  %v768_v47 = vmul.f32 3.0, %v741_v43  ;;  %v835_v48 = vmul.f32 %v1509_v44, %v2178_v11 }
 0x172   :  { %1311 = vst.msk [vmem:[%s2579_s8 + $0xc8] sm:$0xff] %vm115_vm0, %v1511_v46  ;;  %1512 = vtanh.f32 %v613_v45  ;;  %v851_v49 = vmul.f32 %v1511_v46, %v2178_v11 }
 0x173   :  { %1514 = vtanh.f32 %v768_v47  ;;  %1333 = vmatmul.msk.f32.gmra.mxu0 %vm115_vm0, %v835_v48 }
 0x174   :  { %1354 = vmatmul.msk.f32.gmra.mxu1 %vm115_vm0, %v851_v49 }
 0x175   :  { %v588_v18 = vpop.f32.mrf.mxu2 }
 0x176   :  { %v589_v19 = vadd.f32 %v2168_v0, %v588_v18  ;;  %v743_v50 = vpop.f32.mrf.mxu3 }
 0x177   :  { %v744_v51 = vadd.f32 %v2173_v1, %v743_v50 }
 0x178   :  { %v1513_v52 = vpop.eup %1512  ;;  %v614_v53 = vmul.f32 3.0, %v589_v19 }
 0x179   :  { %v1515_v54 = vpop.eup %1514  ;;  %1296 = vst.msk [vmem:[%s2578_s7 + $0xd0] sm:$0xff] %vm115_vm0, %v1513_v52  ;;  %v769_v55 = vmul.f32 3.0, %v744_v51  ;;  %v836_v56 = vmul.f32 %v1513_v52, %v2178_v11 }
 0x17a   :  { %1312 = vst.msk [vmem:[%s2579_s8 + $0xd0] sm:$0xff] %vm115_vm0, %v1515_v54  ;;  %1516 = vtanh.f32 %v614_v53  ;;  %v852_v57 = vmul.f32 %v1515_v54, %v2178_v11 }
 0x17b   :  { %1518 = vtanh.f32 %v769_v55  ;;  %1334 = vmatmul.msk.f32.gmra.mxu0 %vm115_vm0, %v836_v56 }
 0x17c   :  { %1355 = vmatmul.msk.f32.gmra.mxu1 %vm115_vm0, %v852_v57 }
 0x17d   :  { %v591_v58 = vpop.f32.mrf.mxu2 }
 0x17e   :  { %v592_v59 = vadd.f32 %v2168_v0, %v591_v58  ;;  %v746_v60 = vpop.f32.mrf.mxu3 }
 0x17f   :  { %v747_v61 = vadd.f32 %v2173_v1, %v746_v60 }
 0x180   :  { %v1517_v62 = vpop.eup %1516  ;;  %v615_v63 = vmul.f32 3.0, %v592_v59 }
 0x181   :  { %v1519_v2 = vpop.eup %1518  ;;  %1297 = vst.msk [vmem:[%s2578_s7 + $0xd8] sm:$0xff] %vm115_vm0, %v1517_v62  ;;  %v770_v3 = vmul.f32 3.0, %v747_v61  ;;  %v837_v4 = vmul.f32 %v1517_v62, %v2178_v11 }
 0x182   :  { %1313 = vst.msk [vmem:[%s2579_s8 + $0xd8] sm:$0xff] %vm115_vm0, %v1519_v2  ;;  %1520 = vtanh.f32 %v615_v63  ;;  %v853_v29 = vmul.f32 %v1519_v2, %v2178_v11 }
 0x183   :  { %1522 = vtanh.f32 %v770_v3  ;;  %1335 = vmatmul.msk.f32.gmra.mxu0 %vm115_vm0, %v837_v4 }
 0x184   :  { %1356 = vmatmul.msk.f32.gmra.mxu1 %vm115_vm0, %v853_v29 }
 0x185   :  { %v594_v5 = vpop.f32.mrf.mxu2 }
 0x186   :  { %v595_v6 = vadd.f32 %v2168_v0, %v594_v5  ;;  %v749_v7 = vpop.f32.mrf.mxu3 }
 0x187   :  { %v750_v8 = vadd.f32 %v2173_v1, %v749_v7 }
 0x188   :  { %v1521_v9 = vpop.eup %1520  ;;  %v616_v12 = vmul.f32 3.0, %v595_v6 }
 0x189   :  { %v1523_v13 = vpop.eup %1522  ;;  %1298 = vst.msk [vmem:[%s2578_s7 + $0xe0] sm:$0xff] %vm115_vm0, %v1521_v9  ;;  %v771_v14 = vmul.f32 3.0, %v750_v8  ;;  %v838_v15 = vmul.f32 %v1521_v9, %v2178_v11 }
 0x18a   :  { %1314 = vst.msk [vmem:[%s2579_s8 + $0xe0] sm:$0xff] %vm115_vm0, %v1523_v13  ;;  %1524 = vtanh.f32 %v616_v12  ;;  %v854_v16 = vmul.f32 %v1523_v13, %v2178_v11 }
 0x18b   :  { %1526 = vtanh.f32 %v771_v14  ;;  %1336 = vmatmul.msk.f32.gmra.mxu0 %vm115_vm0, %v838_v15 }
 0x18c   :  { %1357 = vmatmul.msk.f32.gmra.mxu1 %vm115_vm0, %v854_v16 }
 0x18d   :  { %v597_v17 = vpop.f32.mrf.mxu2 }
 0x18e   :  { %v598_v20 = vadd.f32 %v2168_v0, %v597_v17  ;;  %v752_v21 = vpop.f32.mrf.mxu3 }
 0x18f   :  { %v753_v22 = vadd.f32 %v2173_v1, %v752_v21 }
 0x190   :  { %v1525_v10 = vpop.eup %1524  ;;  %v617_v23 = vmul.f32 3.0, %v598_v20 }
 0x191   :  { %v1527_v24 = vpop.eup %1526  ;;  %1299 = vst.msk [vmem:[%s2578_s7 + $0xe8] sm:$0xff] %vm115_vm0, %v1525_v10  ;;  %v772_v26 = vmul.f32 3.0, %v753_v22  ;;  %v839_v28 = vmul.f32 %v1525_v10, %v2178_v11 }
 0x192   :  { %1315 = vst.msk [vmem:[%s2579_s8 + $0xe8] sm:$0xff] %vm115_vm0, %v1527_v24  ;;  %1528 = vtanh.f32 %v617_v23  ;;  %v855_v25 = vmul.f32 %v1527_v24, %v2178_v11 }
 0x193   :  { %1530 = vtanh.f32 %v772_v26  ;;  %1337 = vmatmul.msk.f32.gmra.mxu0 %vm115_vm0, %v839_v28 }
 0x194   :  { %1358 = vmatmul.msk.f32.gmra.mxu1 %vm115_vm0, %v855_v25 }
 0x195   :  { %v600_v27 = vpop.f32.mrf.mxu2 }
 0x196   :  { %v601_v30 = vadd.f32 %v2168_v0, %v600_v27  ;;  %v755_v31 = vpop.f32.mrf.mxu3 }
 0x197   :  { %v756_v32 = vadd.f32 %v2173_v1, %v755_v31 }
 0x198   :  { %v1529_v33 = vpop.eup %1528  ;;  %v618_v34 = vmul.f32 3.0, %v601_v30 }
 0x199   :  { %v1531_v35 = vpop.eup %1530  ;;  %1300 = vst.msk [vmem:[%s2578_s7 + $0xf0] sm:$0xff] %vm115_vm0, %v1529_v33  ;;  %v773_v36 = vmul.f32 3.0, %v756_v32  ;;  %v840_v37 = vmul.f32 %v1529_v33, %v2178_v11 }
 0x19a   :  { %1316 = vst.msk [vmem:[%s2579_s8 + $0xf0] sm:$0xff] %vm115_vm0, %v1531_v35  ;;  %1532 = vtanh.f32 %v618_v34  ;;  %v856_v0 = vmul.f32 %v1531_v35, %v2178_v11 }
 0x19b   :  { %1534 = vtanh.f32 %v773_v36  ;;  %1338 = vmatmul.msk.f32.gmra.mxu0 %vm115_vm0, %v840_v37 }
 0x19c   :  { %1359 = vmatmul.msk.f32.gmra.mxu1 %vm115_vm0, %v856_v0 }
 0x1a0   :  { %v1533_v1 = vpop.eup %1532 }
 0x1a1   :  { %v1535_v38 = vpop.eup %1534  ;;  %1301 = vst.msk [vmem:[%s2578_s7 + $0xf8] sm:$0xff] %vm115_vm0, %v1533_v1  ;;  %v841_v39 = vmul.f32 %v1533_v1, %v2178_v11 }
 0x1a2   :  { %1317 = vst.msk [vmem:[%s2579_s8 + $0xf8] sm:$0xff] %vm115_vm0, %v1535_v38  ;;  %v857_v40 = vmul.f32 %v1535_v38, %v2178_v11 }
 0x1a3   :  { %1339 = vmatmul.msk.f32.gmra.mxu0 %vm115_vm0, %v841_v39 }
 0x1a4   :  { %1360 = vmatmul.msk.f32.gmra.mxu1 %vm115_vm0, %v857_v40 }
 0x1a8   :  { %v933_v43 = vpop.f32.mrf.mxu0 }
 0x1a9   :  { %v934_v44 = vadd.f32 %v2404_v41, %v933_v43  ;;  %v1088_v45 = vpop.f32.mrf.mxu1 }
 0x1aa   :  { %v1089_v11 = vadd.f32 %v2409_v42, %v1088_v45 }
 0x1ab   :  { %v981_v46 = vmul.f32 3.0, %v934_v44 }
 0x1ac   :  { %v1136_v47 = vmul.f32 3.0, %v1089_v11 }
 0x1ad   :  { %1536 = vtanh.f32 %v981_v46 }
 0x1ae   :  { %1538 = vtanh.f32 %v1136_v47 }
 0x1b0   :  { %v936_v48 = vpop.f32.mrf.mxu0 }
 0x1b1   :  { %v937_v49 = vadd.f32 %v2404_v41, %v936_v48  ;;  %v1091_v18 = vpop.f32.mrf.mxu1 }
 0x1b2   :  { %v1092_v19 = vadd.f32 %v2409_v42, %v1091_v18 }
 0x1b3   :  { %v1537_v50 = vpop.eup %1536  ;;  %v982_v51 = vmul.f32 3.0, %v937_v49 }
 0x1b4   :  { %v1539_v52 = vpop.eup %1538  ;;  %1361 = vst.msk [vmem:[%s2578_s7 + $0x100] sm:$0xff] %vm115_vm0, %v1537_v50  ;;  %v1137_v53 = vmul.f32 3.0, %v1092_v19 }
 0x1b5   :  { %1377 = vst.msk [vmem:[%s2579_s8 + $0x100] sm:$0xff] %vm115_vm0, %v1539_v52  ;;  %1540 = vtanh.f32 %v982_v51 }
 0x1b6   :  { %1542 = vtanh.f32 %v1137_v53 }
 0x1b8   :  { %v939_v54 = vpop.f32.mrf.mxu0 }
 0x1b9   :  { %v940_v55 = vadd.f32 %v2404_v41, %v939_v54  ;;  %v1094_v56 = vpop.f32.mrf.mxu1 }
 0x1ba   :  { %v1095_v57 = vadd.f32 %v2409_v42, %v1094_v56 }
 0x1bb   :  { %v1541_v58 = vpop.eup %1540  ;;  %v983_v59 = vmul.f32 3.0, %v940_v55 }
 0x1bc   :  { %v1543_v60 = vpop.eup %1542  ;;  %1362 = vst.msk [vmem:[%s2578_s7 + $0x108] sm:$0xff] %vm115_vm0, %v1541_v58  ;;  %v1138_v61 = vmul.f32 3.0, %v1095_v57 }
 0x1bd   :  { %1378 = vst.msk [vmem:[%s2579_s8 + $0x108] sm:$0xff] %vm115_vm0, %v1543_v60  ;;  %1544 = vtanh.f32 %v983_v59 }
 0x1be   :  { %1546 = vtanh.f32 %v1138_v61 }
 0x1c0   :  { %v942_v62 = vpop.f32.mrf.mxu0 }
 0x1c1   :  { %v943_v63 = vadd.f32 %v2404_v41, %v942_v62  ;;  %v1097_v2 = vpop.f32.mrf.mxu1 }
 0x1c2   :  { %v1098_v3 = vadd.f32 %v2409_v42, %v1097_v2 }
 0x1c3   :  { %v1545_v4 = vpop.eup %1544  ;;  %v984_v29 = vmul.f32 3.0, %v943_v63 }
 0x1c4   :  { %v1547_v5 = vpop.eup %1546  ;;  %1363 = vst.msk [vmem:[%s2578_s7 + $0x110] sm:$0xff] %vm115_vm0, %v1545_v4  ;;  %v1139_v6 = vmul.f32 3.0, %v1098_v3 }
 0x1c5   :  { %1379 = vst.msk [vmem:[%s2579_s8 + $0x110] sm:$0xff] %vm115_vm0, %v1547_v5  ;;  %1548 = vtanh.f32 %v984_v29 }
 0x1c6   :  { %1550 = vtanh.f32 %v1139_v6 }
 0x1c8   :  { %v945_v7 = vpop.f32.mrf.mxu0 }
 0x1c9   :  { %v946_v8 = vadd.f32 %v2404_v41, %v945_v7  ;;  %v1100_v9 = vpop.f32.mrf.mxu1 }
 0x1ca   :  { %v1101_v12 = vadd.f32 %v2409_v42, %v1100_v9 }
 0x1cb   :  { %v1549_v13 = vpop.eup %1548  ;;  %v985_v14 = vmul.f32 3.0, %v946_v8 }
 0x1cc   :  { %v1551_v15 = vpop.eup %1550  ;;  %1364 = vst.msk [vmem:[%s2578_s7 + $0x118] sm:$0xff] %vm115_vm0, %v1549_v13  ;;  %v1140_v16 = vmul.f32 3.0, %v1101_v12 }
 0x1cd   :  { %1380 = vst.msk [vmem:[%s2579_s8 + $0x118] sm:$0xff] %vm115_vm0, %v1551_v15  ;;  %1552 = vtanh.f32 %v985_v14 }
 0x1ce   :  { %1554 = vtanh.f32 %v1140_v16 }
 0x1d0   :  { %v948_v17 = vpop.f32.mrf.mxu0 }
 0x1d1   :  { %v949_v20 = vadd.f32 %v2404_v41, %v948_v17  ;;  %v1103_v21 = vpop.f32.mrf.mxu1 }
 0x1d2   :  { %v1104_v22 = vadd.f32 %v2409_v42, %v1103_v21 }
 0x1d3   :  { %v1553_v10 = vpop.eup %1552  ;;  %v986_v23 = vmul.f32 3.0, %v949_v20 }
 0x1d4   :  { %v1555_v24 = vpop.eup %1554  ;;  %1365 = vst.msk [vmem:[%s2578_s7 + $0x120] sm:$0xff] %vm115_vm0, %v1553_v10  ;;  %v1141_v26 = vmul.f32 3.0, %v1104_v22 }
 0x1d5   :  { %1381 = vst.msk [vmem:[%s2579_s8 + $0x120] sm:$0xff] %vm115_vm0, %v1555_v24  ;;  %1556 = vtanh.f32 %v986_v23 }
 0x1d6   :  { %1558 = vtanh.f32 %v1141_v26 }
 0x1d8   :  { %v951_v28 = vpop.f32.mrf.mxu0 }
 0x1d9   :  { %v952_v25 = vadd.f32 %v2404_v41, %v951_v28  ;;  %v1106_v27 = vpop.f32.mrf.mxu1 }
 0x1da   :  { %v1107_v30 = vadd.f32 %v2409_v42, %v1106_v27 }
 0x1db   :  { %v1557_v31 = vpop.eup %1556  ;;  %v987_v32 = vmul.f32 3.0, %v952_v25 }
 0x1dc   :  { %v1559_v33 = vpop.eup %1558  ;;  %1366 = vst.msk [vmem:[%s2578_s7 + $0x128] sm:$0xff] %vm115_vm0, %v1557_v31  ;;  %v1142_v34 = vmul.f32 3.0, %v1107_v30 }
 0x1dd   :  { %1382 = vst.msk [vmem:[%s2579_s8 + $0x128] sm:$0xff] %vm115_vm0, %v1559_v33  ;;  %1560 = vtanh.f32 %v987_v32 }
 0x1de   :  { %1562 = vtanh.f32 %v1142_v34 }
 0x1e0   :  { %v954_v35 = vpop.f32.mrf.mxu0 }
 0x1e1   :  { %v955_v36 = vadd.f32 %v2404_v41, %v954_v35  ;;  %v1109_v37 = vpop.f32.mrf.mxu1 }
 0x1e2   :  { %v1110_v0 = vadd.f32 %v2409_v42, %v1109_v37 }
 0x1e3   :  { %v1561_v1 = vpop.eup %1560  ;;  %v988_v38 = vmul.f32 3.0, %v955_v36 }
 0x1e4   :  { %v1563_v39 = vpop.eup %1562  ;;  %1367 = vst.msk [vmem:[%s2578_s7 + $0x130] sm:$0xff] %vm115_vm0, %v1561_v1  ;;  %v1143_v40 = vmul.f32 3.0, %v1110_v0 }
 0x1e5   :  { %1383 = vst.msk [vmem:[%s2579_s8 + $0x130] sm:$0xff] %vm115_vm0, %v1563_v39  ;;  %1564 = vtanh.f32 %v988_v38 }
 0x1e6   :  { %1566 = vtanh.f32 %v1143_v40 }
 0x1e8   :  { %v957_v43 = vpop.f32.mrf.mxu0 }
 0x1e9   :  { %v958_v44 = vadd.f32 %v2404_v41, %v957_v43  ;;  %v1112_v45 = vpop.f32.mrf.mxu1 }
 0x1ea   :  { %v1113_v11 = vadd.f32 %v2409_v42, %v1112_v45 }
 0x1eb   :  { %v1565_v46 = vpop.eup %1564  ;;  %v989_v47 = vmul.f32 3.0, %v958_v44 }
 0x1ec   :  { %v1567_v48 = vpop.eup %1566  ;;  %1368 = vst.msk [vmem:[%s2578_s7 + $0x138] sm:$0xff] %vm115_vm0, %v1565_v46  ;;  %v1144_v49 = vmul.f32 3.0, %v1113_v11 }
 0x1ed   :  { %1384 = vst.msk [vmem:[%s2579_s8 + $0x138] sm:$0xff] %vm115_vm0, %v1567_v48  ;;  %1568 = vtanh.f32 %v989_v47 }
 0x1ee   :  { %1570 = vtanh.f32 %v1144_v49 }
 0x1f0   :  { %v960_v18 = vpop.f32.mrf.mxu0 }
 0x1f1   :  { %v961_v19 = vadd.f32 %v2404_v41, %v960_v18  ;;  %v1115_v50 = vpop.f32.mrf.mxu1 }
 0x1f2   :  { %v1116_v51 = vadd.f32 %v2409_v42, %v1115_v50 }
 0x1f3   :  { %v1569_v52 = vpop.eup %1568  ;;  %v990_v53 = vmul.f32 3.0, %v961_v19 }
 0x1f4   :  { %v1571_v54 = vpop.eup %1570  ;;  %1369 = vst.msk [vmem:[%s2578_s7 + $0x140] sm:$0xff] %vm115_vm0, %v1569_v52  ;;  %v1145_v55 = vmul.f32 3.0, %v1116_v51 }
 0x1f5   :  { %1385 = vst.msk [vmem:[%s2579_s8 + $0x140] sm:$0xff] %vm115_vm0, %v1571_v54  ;;  %1572 = vtanh.f32 %v990_v53 }
 0x1f6   :  { %1574 = vtanh.f32 %v1145_v55 }
 0x1f8   :  { %v963_v56 = vpop.f32.mrf.mxu0 }
 0x1f9   :  { %v964_v57 = vadd.f32 %v2404_v41, %v963_v56  ;;  %v1118_v58 = vpop.f32.mrf.mxu1 }
 0x1fa   :  { %v1119_v59 = vadd.f32 %v2409_v42, %v1118_v58 }
 0x1fb   :  { %v1573_v60 = vpop.eup %1572  ;;  %v991_v61 = vmul.f32 3.0, %v964_v57 }
 0x1fc   :  { %v1575_v62 = vpop.eup %1574  ;;  %1370 = vst.msk [vmem:[%s2578_s7 + $0x148] sm:$0xff] %vm115_vm0, %v1573_v60  ;;  %v1146_v63 = vmul.f32 3.0, %v1119_v59 }
 0x1fd   :  { %1386 = vst.msk [vmem:[%s2579_s8 + $0x148] sm:$0xff] %vm115_vm0, %v1575_v62  ;;  %1576 = vtanh.f32 %v991_v61 }
 0x1fe   :  { %1578 = vtanh.f32 %v1146_v63 }
 0x200   :  { %v966_v2 = vpop.f32.mrf.mxu0 }
 0x201   :  { %v967_v3 = vadd.f32 %v2404_v41, %v966_v2  ;;  %v1121_v4 = vpop.f32.mrf.mxu1 }
 0x202   :  { %v1122_v29 = vadd.f32 %v2409_v42, %v1121_v4 }
 0x203   :  { %v1577_v5 = vpop.eup %1576  ;;  %v992_v6 = vmul.f32 3.0, %v967_v3 }
 0x204   :  { %v1579_v7 = vpop.eup %1578  ;;  %1371 = vst.msk [vmem:[%s2578_s7 + $0x150] sm:$0xff] %vm115_vm0, %v1577_v5  ;;  %v1147_v8 = vmul.f32 3.0, %v1122_v29 }
 0x205   :  { %1387 = vst.msk [vmem:[%s2579_s8 + $0x150] sm:$0xff] %vm115_vm0, %v1579_v7  ;;  %1580 = vtanh.f32 %v992_v6 }
 0x206   :  { %1582 = vtanh.f32 %v1147_v8 }
 0x208   :  { %v969_v9 = vpop.f32.mrf.mxu0 }
 0x209   :  { %v970_v12 = vadd.f32 %v2404_v41, %v969_v9  ;;  %v1124_v13 = vpop.f32.mrf.mxu1 }
 0x20a   :  { %v1125_v14 = vadd.f32 %v2409_v42, %v1124_v13 }
 0x20b   :  { %v1581_v15 = vpop.eup %1580  ;;  %v993_v16 = vmul.f32 3.0, %v970_v12 }
 0x20c   :  { %v1583_v17 = vpop.eup %1582  ;;  %1372 = vst.msk [vmem:[%s2578_s7 + $0x158] sm:$0xff] %vm115_vm0, %v1581_v15  ;;  %v1148_v20 = vmul.f32 3.0, %v1125_v14 }
 0x20d   :  { %1388 = vst.msk [vmem:[%s2579_s8 + $0x158] sm:$0xff] %vm115_vm0, %v1583_v17  ;;  %1584 = vtanh.f32 %v993_v16 }
 0x20e   :  { %1586 = vtanh.f32 %v1148_v20 }
 0x210   :  { %v972_v21 = vpop.f32.mrf.mxu0 }
 0x211   :  { %v973_v22 = vadd.f32 %v2404_v41, %v972_v21  ;;  %v1127_v10 = vpop.f32.mrf.mxu1 }
 0x212   :  { %v1128_v23 = vadd.f32 %v2409_v42, %v1127_v10 }
 0x213   :  { %v1585_v24 = vpop.eup %1584  ;;  %v994_v26 = vmul.f32 3.0, %v973_v22 }
 0x214   :  { %v1587_v28 = vpop.eup %1586  ;;  %1373 = vst.msk [vmem:[%s2578_s7 + $0x160] sm:$0xff] %vm115_vm0, %v1585_v24  ;;  %v1149_v25 = vmul.f32 3.0, %v1128_v23 }
 0x215   :  { %1389 = vst.msk [vmem:[%s2579_s8 + $0x160] sm:$0xff] %vm115_vm0, %v1587_v28  ;;  %1588 = vtanh.f32 %v994_v26 }
 0x216   :  { %1590 = vtanh.f32 %v1149_v25 }
 0x218   :  { %v975_v27 = vpop.f32.mrf.mxu0 }
 0x219   :  { %v976_v30 = vadd.f32 %v2404_v41, %v975_v27  ;;  %v1130_v31 = vpop.f32.mrf.mxu1 }
 0x21a   :  { %v1131_v32 = vadd.f32 %v2409_v42, %v1130_v31 }
 0x21b   :  { %v1589_v33 = vpop.eup %1588  ;;  %v995_v34 = vmul.f32 3.0, %v976_v30 }
 0x21c   :  { %v1591_v35 = vpop.eup %1590  ;;  %1374 = vst.msk [vmem:[%s2578_s7 + $0x168] sm:$0xff] %vm115_vm0, %v1589_v33  ;;  %v1150_v36 = vmul.f32 3.0, %v1131_v32 }
 0x21d   :  { %1390 = vst.msk [vmem:[%s2579_s8 + $0x168] sm:$0xff] %vm115_vm0, %v1591_v35  ;;  %1592 = vtanh.f32 %v995_v34 }
 0x21e   :  { %1594 = vtanh.f32 %v1150_v36 }
 0x220   :  { %v978_v37 = vpop.f32.mrf.mxu0 }
 0x221   :  { %v979_v0 = vadd.f32 %v2404_v41, %v978_v37  ;;  %v1133_v1 = vpop.f32.mrf.mxu1 }
 0x222   :  { %v1134_v38 = vadd.f32 %v2409_v42, %v1133_v1 }
 0x223   :  { %v1593_v39 = vpop.eup %1592  ;;  %v996_v40 = vmul.f32 3.0, %v979_v0 }
 0x224   :  { %v1595_v43 = vpop.eup %1594  ;;  %1375 = vst.msk [vmem:[%s2578_s7 + $0x170] sm:$0xff] %vm115_vm0, %v1593_v39  ;;  %v1151_v44 = vmul.f32 3.0, %v1134_v38 }
 0x225   :  { %1391 = vst.msk [vmem:[%s2579_s8 + $0x170] sm:$0xff] %vm115_vm0, %v1595_v43  ;;  %1596 = vtanh.f32 %v996_v40 }
 0x226   :  { %1598 = vtanh.f32 %v1151_v44 }
 0x22b   :  { %v1597_v41 = vpop.eup %1596 }
 0x22c   :  { %v1599_v45 = vpop.eup %1598  ;;  %1376 = vst.msk [vmem:[%s2578_s7 + $0x178] sm:$0xff] %vm115_vm0, %v1597_v41 }
 0x22d   :  { %1392 = vst.msk [vmem:[%s2579_s8 + $0x178] sm:$0xff] %vm115_vm0, %v1599_v45 }
 0x22e   :  { %1210 = vsyncpa [#allocation3], 1 }

</bundles_post_ra>
